<compile_context>
chip_gen: v7x
topology: tpu7x:2x2x1
jax: 0.10.0
libtpu: 0.0.40
codegen_flags: <defaults>
</compile_context>

<pallas_src>
import jax
import jax.numpy as jnp
from jax import lax
from jax.experimental import pallas as pl
from jax.experimental.pallas import tpu as pltpu


def _round_up(x, m):
    return ((x + m - 1) // m) * m


# ----------------------------------------------------------------------------
# Fused Pallas kernel: encoder -> (+noise) -> decoder
# ----------------------------------------------------------------------------
def _make_fused_ae_kernel(n_enc, n_dec, add_noise, delta):
    """Builds kernel(seed_ref, x_ref, w1, b1, ..., wN, bN, o_ref)."""

    def kernel(seed_ref, x_ref, *rest):
        o_ref = rest[-1]
        wb = rest[:-1]

        # Activations carried in bf16 between layers (bit-identical MXU inputs,
        # half the VMEM spill bytes); accumulation + bias/ReLU epilogue in f32.
        h = x_ref[...].astype(jnp.bfloat16)          # (tile_b, D_in)
        idx = 0

        # ---- Encoder: Linear (+ReLU on all but last layer) ------------------
        for li in range(n_enc):
            w = wb[idx][...]                         # bf16, VMEM-resident
            b = wb[idx + 1][...]                     # f32 (1, Dout)
            idx += 2
            acc = jnp.dot(h, w, preferred_element_type=jnp.float32) + b
            if li < n_enc - 1:
                h = jnp.maximum(acc, 0.0).astype(jnp.bfloat16)
            else:
                h = acc                              # bottleneck stays f32

        # ---- Quantization noise (in-kernel, platform-portable) --------------
        # TODO(synk): exact PyTorch generate_noise() not given; modeled as
        # uniform quantization noise in [-0.5, 0.5) * 2^-b_quantization.
        if add_noise:
            tile_b = h.shape[0]
            # Noise keyed on (seed, global batch row, latent col) so it is
            # independent of the tiling policy.
            rows = (lax.broadcasted_iota(jnp.int32, h.shape, 0)
                    + pl.program_id(0) * tile_b).astype(jnp.uint32)
            cols = lax.broadcasted_iota(jnp.int32, h.shape, 1).astype(jnp.uint32)
            seed = seed_ref[0].astype(jnp.uint32)
            bits = ((rows * jnp.uint32(0x9E3779B1))
                    ^ (cols * jnp.uint32(0x85EBCA6B))
                    ^ (seed * jnp.uint32(0x27D4EB2F)))
            bits = bits ^ (bits >> 15)
            bits = bits * jnp.uint32(0x2C1B3C6D)
            bits = bits ^ (bits >> 12)
            bits = bits * jnp.uint32(0x297A2D39)
            bits = bits ^ (bits >> 15)
            # Exponent trick: mantissa bits -> f32 in [1, 2), shift to [-0.5, 0.5).
            mant = (bits & jnp.uint32(0x007FFFFF)) | jnp.uint32(0x3F800000)
            u = lax.bitcast_convert_type(mant, jnp.float32) - 1.5
            h = h + delta * u

        h = h.astype(jnp.bfloat16)

        # ---- Decoder: mirrored Linear (+ReLU on all but last layer) ---------
        for li in range(n_dec):
            w = wb[idx][...]
            b = wb[idx + 1][...]
            idx += 2
            acc = jnp.dot(h, w, preferred_element_type=jnp.float32) + b
            if li < n_dec - 1:
                h = jnp.maximum(acc, 0.0).astype(jnp.bfloat16)
            else:
                h = acc                              # final output in f32

        o_ref[...] = h.astype(o_ref.dtype)

    return kernel


# ----------------------------------------------------------------------------
# Parameters
# ----------------------------------------------------------------------------
def init_ae_params(key, arch):
    """arch: encoder widths, e.g. [1024, 256, 64]; decoder mirrors it.
    Weights stored in bf16 (MXU operands), biases in f32 (epilogue)."""
    params = {"encoder": [], "decoder": []}
    dec_arch = arch[::-1]

    def init_layer(k, din, dout):
        kw, _ = jax.random.split(k)
        scale = (2.0 / din) ** 0.5
        w = (scale * jax.random.normal(kw, (din, dout), dtype=jnp.float32)
             ).astype(jnp.bfloat16)
        b = jnp.zeros((1, dout), dtype=jnp.float32)
        return w, b

    keys = jax.random.split(key, 2 * (len(arch) - 1))
    ki = 0
    for din, dout in zip(arch[:-1], arch[1:]):
        params["encoder"].append(init_layer(keys[ki], din, dout)); ki += 1
    for din, dout in zip(dec_arch[:-1], dec_arch[1:]):
        params["decoder"].append(init_layer(keys[ki], din, dout)); ki += 1
    return params


# ----------------------------------------------------------------------------
# Forward pass (single fused pallas_call)
# ----------------------------------------------------------------------------
def ae_forward(params, x_nchw, config, seed):
    B, C, H, W = x_nchw.shape
    d_in = C * H * W
    x = x_nchw.reshape(B, d_in).astype(jnp.float32)

    enc = params["encoder"]
    dec = params["decoder"]
    n_enc, n_dec = len(enc), len(dec)
    layers = enc + dec
    d_out = dec[-1][0].shape[1]

    # Batch tiling: single tile only for tiny B; otherwise >= 2 grid steps so
    # BlockSpec double-buffering hides the x/out HBM traffic and v7x can shard
    # the "parallel" axis across both TensorCores.  Tiles grow up to 512 rows
    # for large B (better HBM efficiency, MXU stays fed).
    if B < 64:
        tile_b, b_pad = B, B
    else:
        tile_b = min(512, _round_up(pl.cdiv(B, 2), 8))
        b_pad = _round_up(B, tile_b)
    if b_pad != B:
        x = jnp.pad(x, ((0, b_pad - B), (0, 0)))
    n_tiles = b_pad // tile_b

    flat_wb = []
    for w, b in layers:
        flat_wb += [w, b]

    add_noise = bool(config["add_noise"])
    delta = float(2.0 ** (-config["b_quantization"]))
    kernel = _make_fused_ae_kernel(n_enc, n_dec, add_noise, delta)

    # index_maps receive (grid_i, seed_ref) because of num_scalar_prefetch=1.
    in_specs = [pl.BlockSpec((tile_b, d_in), lambda i, s: (i, 0))]
    for w, b in layers:
        in_specs.append(pl.BlockSpec(w.shape, lambda i, s: (0, 0)))
        in_specs.append(pl.BlockSpec(b.shape, lambda i, s: (0, 0)))
    out_spec = pl.BlockSpec((tile_b, d_out), lambda i, s: (i, 0))

    # Explicit VMEM budget: resident (double-buffered) weights + live activation
    # tiles + double-buffered x/out tiles; cap is generation-aware (v7x: 64 MiB).
    param_bytes = sum(int(a.size) * a.dtype.itemsize for a in flat_wb)
    widths = [d_in] + [w.shape[1] for w, _ in layers]
    act_bytes = 6 * tile_b * max(widths) * 4
    io_bytes = 2 * tile_b * (d_in + d_out) * 4
    vmem_needed = 2 * param_bytes + act_bytes + io_bytes + (2 << 20)
    try:
        vmem_cap = pltpu.get_tpu_info().vmem_capacity_bytes
    except Exception:
        vmem_cap = 64 << 20  # conservative per-TC floor (v7x)
    vmem_limit = int(min(max(vmem_needed, 16 << 20), (vmem_cap * 3) // 4))

    # Cost hint so XLA schedules the surrounding reshape/pad/slice sensibly.
    flops = 2 * b_pad * sum(w.shape[0] * w.shape[1] for w, _ in layers)
    bytes_accessed = b_pad * (d_in + d_out) * 4 + param_bytes
    cost = pl.CostEstimate(flops=flops, transcendentals=0,
                           bytes_accessed=bytes_accessed)

    grid_spec = pltpu.PrefetchScalarGridSpec(
        num_scalar_prefetch=1,
        grid=(n_tiles,),
        in_specs=in_specs,
        out_specs=out_spec,
    )

    seed_arr = jnp.asarray([seed], dtype=jnp.int32)
    out = pl.pallas_call(
        kernel,
        out_shape=jax.ShapeDtypeStruct((b_pad, d_out), jnp.float32),
        grid_spec=grid_spec,
        compiler_params=pltpu.CompilerParams(
            dimension_semantics=("parallel",),
            vmem_limit_bytes=vmem_limit,
        ),
        cost_estimate=cost,
    )(seed_arr, x, *flat_wb)

    out = out[:B].reshape(B, C, H, W)
    return {"generated_image": out}


def compute_loss(output, target_images, config):
    gen = output["generated_image"]
    recon_loss = jnp.mean((gen - target_images) ** 2)  # torch.nn.MSELoss
    return config["reconstruction_loss_weight"] * recon_loss


# ----------------------------------------------------------------------------
# Pure-JAX reference (same bf16-operand / f32-accumulation recipe)
# ----------------------------------------------------------------------------
def ae_forward_ref(params, x_nchw):
    B, C, H, W = x_nchw.shape
    h = x_nchw.reshape(B, C * H * W).astype(jnp.float32)
    n_enc = len(params["encoder"])
    for li, (w, b) in enumerate(params["encoder"]):
        h = jnp.dot(h.astype(w.dtype), w, preferred_element_type=jnp.float32) + b
        if li < n_enc - 1:
            h = jnp.maximum(h, 0.0)
    n_dec = len(params["decoder"])
    for li, (w, b) in enumerate(params["decoder"]):
        h = jnp.dot(h.astype(w.dtype), w, preferred_element_type=jnp.float32) + b
        if li < n_dec - 1:
            h = jnp.maximum(h, 0.0)
    return {"generated_image": h.reshape(B, C, H, W)}


# ----------------------------------------------------------------------------
if __name__ == "__main__":
    config = {
        "add_noise": True,
        "b_quantization": 4,
        "reconstruction_loss_weight": 1.0,
        "device": "tpu",
    }
    # Small shapes: batch=2, channels=4, spatial=16x16 -> flattened dim 1024.
    B, C, H, W = 2, 4, 16, 16
    arch = [C * H * W, 256, 64]  # encoder widths; decoder mirrors

    key = jax.random.PRNGKey(0)
    k_param, k_x = jax.random.split(key)

    params = init_ae_params(k_param, arch)
    x = jax.random.normal(k_x, (B, C, H, W), dtype=jnp.float32)

    # 1) Noiseless path: parity check against the pure-JAX reference.
    cfg_nonoise = dict(config, add_noise=False)
    out0 = ae_forward(params, x, cfg_nonoise, seed=0)
    gen0 = jax.block_until_ready(out0["generated_image"])
    assert gen0.shape == (B, C, H, W), gen0.shape
    ref0 = ae_forward_ref(params, x)["generated_image"]
    max_err = float(jnp.max(jnp.abs(gen0 - ref0)))
    assert max_err < 1e-2, max_err

    # 2) Noisy path: in-kernel hash-based uniform noise (deterministic per
    #    seed, independent of tiling); check shape, finiteness, bounded delta.
    out1 = ae_forward(params, x, config, seed=1234)
    gen1 = jax.block_until_ready(out1["generated_image"])
    assert gen1.shape == (B, C, H, W), gen1.shape
    assert bool(jnp.all(jnp.isfinite(gen1)))
    assert float(jnp.max(jnp.abs(gen1 - gen0))) < 10.0

    loss = jax.block_until_ready(compute_loss(out1, x, config))
    assert jnp.isfinite(loss)

    print("KERNEL_OK")
</pallas_src>

<mosaic_0001>
module attributes {stable_mosaic.version = 11 : i64} {
  func.func @kernel(%arg0: i32, %arg1: memref<1xi32, #tpu.memory_space<smem>>, %arg2: memref<2x1024xf32, #tpu.memory_space<vmem>>, %arg3: memref<1024x256xbf16, #tpu.memory_space<vmem>>, %arg4: memref<1x256xf32, #tpu.memory_space<vmem>>, %arg5: memref<256x64xbf16, #tpu.memory_space<vmem>>, %arg6: memref<1x64xf32, #tpu.memory_space<vmem>>, %arg7: memref<64x256xbf16, #tpu.memory_space<vmem>>, %arg8: memref<1x256xf32, #tpu.memory_space<vmem>>, %arg9: memref<256x1024xbf16, #tpu.memory_space<vmem>>, %arg10: memref<1x1024xf32, #tpu.memory_space<vmem>>, %arg11: memref<2x1024xf32, #tpu.memory_space<vmem>>) attributes {dimension_semantics = [#tpu.dimension_semantics<parallel>], iteration_bounds = array<i64: 1>, scalar_prefetch = 1 : i64, scratch_operands = 0 : i64, tpu.core_type = #tpu.core_type<tc>, window_params = [{transform_indices = @transform_0, window_bounds = array<i64: 2, 1024>}, {pipeline_mode = #tpu.pipeline_mode<synchronous>, transform_indices = @transform_1, window_bounds = array<i64: 1024, 256>}, {pipeline_mode = #tpu.pipeline_mode<synchronous>, transform_indices = @transform_2, window_bounds = array<i64: 1, 256>}, {pipeline_mode = #tpu.pipeline_mode<synchronous>, transform_indices = @transform_3, window_bounds = array<i64: 256, 64>}, {pipeline_mode = #tpu.pipeline_mode<synchronous>, transform_indices = @transform_4, window_bounds = array<i64: 1, 64>}, {pipeline_mode = #tpu.pipeline_mode<synchronous>, transform_indices = @transform_5, window_bounds = array<i64: 64, 256>}, {pipeline_mode = #tpu.pipeline_mode<synchronous>, transform_indices = @transform_6, window_bounds = array<i64: 1, 256>}, {pipeline_mode = #tpu.pipeline_mode<synchronous>, transform_indices = @transform_7, window_bounds = array<i64: 256, 1024>}, {pipeline_mode = #tpu.pipeline_mode<synchronous>, transform_indices = @transform_8, window_bounds = array<i64: 1, 1024>}, {transform_indices = @transform_9, window_bounds = array<i64: 2, 1024>}]} {
    %c0 = arith.constant 0 : index
    %c0_0 = arith.constant 0 : index
    %0 = vector.load %arg2[%c0, %c0_0] : memref<2x1024xf32, #tpu.memory_space<vmem>>, vector<2x1024xf32>
    %1 = arith.truncf %0 : vector<2x1024xf32> to vector<2x1024xbf16>
    %c0_1 = arith.constant 0 : index
    %c0_2 = arith.constant 0 : index
    %2 = vector.load %arg3[%c0_1, %c0_2] : memref<1024x256xbf16, #tpu.memory_space<vmem>>, vector<1024x256xbf16>
    %c0_3 = arith.constant 0 : index
    %c0_4 = arith.constant 0 : index
    %3 = vector.load %arg4[%c0_3, %c0_4] : memref<1x256xf32, #tpu.memory_space<vmem>>, vector<1x256xf32>
    %cst = arith.constant dense<0.000000e+00> : vector<2x256xf32>
    %4 = tpu.matmul %1, %2, %cst {dimension_numbers = #tpu.dot_dimension_numbers<[1], [0], [0], [1], [0, 0, 1, 1], [], []>} : vector<2x1024xbf16>, vector<1024x256xbf16>, vector<2x256xf32> -> vector<2x256xf32>
    %5 = vector.broadcast %3 : vector<1x256xf32> to vector<2x256xf32>
    %6 = arith.addf %4, %5 : vector<2x256xf32>
    %cst_5 = arith.constant 0.000000e+00 : f32
    %7 = vector.broadcast %cst_5 : f32 to vector<2x256xf32>
    %8 = arith.maximumf %6, %7 : vector<2x256xf32>
    %9 = arith.truncf %8 : vector<2x256xf32> to vector<2x256xbf16>
    %c0_6 = arith.constant 0 : index
    %c0_7 = arith.constant 0 : index
    %10 = vector.load %arg5[%c0_6, %c0_7] : memref<256x64xbf16, #tpu.memory_space<vmem>>, vector<256x64xbf16>
    %c0_8 = arith.constant 0 : index
    %c0_9 = arith.constant 0 : index
    %11 = vector.load %arg6[%c0_8, %c0_9] : memref<1x64xf32, #tpu.memory_space<vmem>>, vector<1x64xf32>
    %cst_10 = arith.constant dense<0.000000e+00> : vector<2x64xf32>
    %12 = tpu.matmul %9, %10, %cst_10 {dimension_numbers = #tpu.dot_dimension_numbers<[1], [0], [0], [1], [0, 0, 1, 1], [], []>} : vector<2x256xbf16>, vector<256x64xbf16>, vector<2x64xf32> -> vector<2x64xf32>
    %13 = vector.broadcast %11 : vector<1x64xf32> to vector<2x64xf32>
    %14 = arith.addf %12, %13 : vector<2x64xf32>
    %15 = arith.truncf %14 : vector<2x64xf32> to vector<2x64xbf16>
    %c0_11 = arith.constant 0 : index
    %c0_12 = arith.constant 0 : index
    %16 = vector.load %arg7[%c0_11, %c0_12] : memref<64x256xbf16, #tpu.memory_space<vmem>>, vector<64x256xbf16>
    %c0_13 = arith.constant 0 : index
    %c0_14 = arith.constant 0 : index
    %17 = vector.load %arg8[%c0_13, %c0_14] : memref<1x256xf32, #tpu.memory_space<vmem>>, vector<1x256xf32>
    %cst_15 = arith.constant dense<0.000000e+00> : vector<2x256xf32>
    %18 = tpu.matmul %15, %16, %cst_15 {dimension_numbers = #tpu.dot_dimension_numbers<[1], [0], [0], [1], [0, 0, 1, 1], [], []>} : vector<2x64xbf16>, vector<64x256xbf16>, vector<2x256xf32> -> vector<2x256xf32>
    %19 = vector.broadcast %17 : vector<1x256xf32> to vector<2x256xf32>
    %20 = arith.addf %18, %19 : vector<2x256xf32>
    %cst_16 = arith.constant 0.000000e+00 : f32
    %21 = vector.broadcast %cst_16 : f32 to vector<2x256xf32>
    %22 = arith.maximumf %20, %21 : vector<2x256xf32>
    %23 = arith.truncf %22 : vector<2x256xf32> to vector<2x256xbf16>
    %c0_17 = arith.constant 0 : index
    %c0_18 = arith.constant 0 : index
    %24 = vector.load %arg9[%c0_17, %c0_18] : memref<256x1024xbf16, #tpu.memory_space<vmem>>, vector<256x1024xbf16>
    %c0_19 = arith.constant 0 : index
    %c0_20 = arith.constant 0 : index
    %25 = vector.load %arg10[%c0_19, %c0_20] : memref<1x1024xf32, #tpu.memory_space<vmem>>, vector<1x1024xf32>
    %cst_21 = arith.constant dense<0.000000e+00> : vector<2x1024xf32>
    %26 = tpu.matmul %23, %24, %cst_21 {dimension_numbers = #tpu.dot_dimension_numbers<[1], [0], [0], [1], [0, 0, 1, 1], [], []>} : vector<2x256xbf16>, vector<256x1024xbf16>, vector<2x1024xf32> -> vector<2x1024xf32>
    %27 = vector.broadcast %25 : vector<1x1024xf32> to vector<2x1024xf32>
    %28 = arith.addf %26, %27 : vector<2x1024xf32>
    %c0_22 = arith.constant 0 : index
    %c0_23 = arith.constant 0 : index
    %29 = vector.load %arg11[%c0_22, %c0_23] : memref<2x1024xf32, #tpu.memory_space<vmem>>, vector<2x1024xf32>
    tpu.vector_store %arg11[%c0_22, %c0_23], %28 {strides = array<i32>} : memref<2x1024xf32, #tpu.memory_space<vmem>>, vector<2x1024xf32>,
    return
  }
  func.func @transform_0(%arg0: i32, %arg1: memref<1xi32, #tpu.memory_space<smem>>) -> (i32, i32) {
    %c0_i32 = arith.constant 0 : i32
    %c0_i32_0 = arith.constant 0 : i32
    return %arg0, %c0_i32 : i32, i32
  }
  func.func @transform_1(%arg0: i32, %arg1: memref<1xi32, #tpu.memory_space<smem>>) -> (i32, i32) {
    %c0_i32 = arith.constant 0 : i32
    %c0_i32_0 = arith.constant 0 : i32
    %c0_i32_1 = arith.constant 0 : i32
    return %c0_i32, %c0_i32_0 : i32, i32
  }
  func.func @transform_2(%arg0: i32, %arg1: memref<1xi32, #tpu.memory_space<smem>>) -> (i32, i32) {
    %c0_i32 = arith.constant 0 : i32
    %c0_i32_0 = arith.constant 0 : i32
    %c0_i32_1 = arith.constant 0 : i32
    return %c0_i32, %c0_i32_0 : i32, i32
  }
  func.func @transform_3(%arg0: i32, %arg1: memref<1xi32, #tpu.memory_space<smem>>) -> (i32, i32) {
    %c0_i32 = arith.constant 0 : i32
    %c0_i32_0 = arith.constant 0 : i32
    %c0_i32_1 = arith.constant 0 : i32
    return %c0_i32, %c0_i32_0 : i32, i32
  }
  func.func @transform_4(%arg0: i32, %arg1: memref<1xi32, #tpu.memory_space<smem>>) -> (i32, i32) {
    %c0_i32 = arith.constant 0 : i32
    %c0_i32_0 = arith.constant 0 : i32
    %c0_i32_1 = arith.constant 0 : i32
    return %c0_i32, %c0_i32_0 : i32, i32
  }
  func.func @transform_5(%arg0: i32, %arg1: memref<1xi32, #tpu.memory_space<smem>>) -> (i32, i32) {
    %c0_i32 = arith.constant 0 : i32
    %c0_i32_0 = arith.constant 0 : i32
    %c0_i32_1 = arith.constant 0 : i32
    return %c0_i32, %c0_i32_0 : i32, i32
  }
  func.func @transform_6(%arg0: i32, %arg1: memref<1xi32, #tpu.memory_space<smem>>) -> (i32, i32) {
    %c0_i32 = arith.constant 0 : i32
    %c0_i32_0 = arith.constant 0 : i32
    %c0_i32_1 = arith.constant 0 : i32
    return %c0_i32, %c0_i32_0 : i32, i32
  }
  func.func @transform_7(%arg0: i32, %arg1: memref<1xi32, #tpu.memory_space<smem>>) -> (i32, i32) {
    %c0_i32 = arith.constant 0 : i32
    %c0_i32_0 = arith.constant 0 : i32
    %c0_i32_1 = arith.constant 0 : i32
    return %c0_i32, %c0_i32_0 : i32, i32
  }
  func.func @transform_8(%arg0: i32, %arg1: memref<1xi32, #tpu.memory_space<smem>>) -> (i32, i32) {
    %c0_i32 = arith.constant 0 : i32
    %c0_i32_0 = arith.constant 0 : i32
    %c0_i32_1 = arith.constant 0 : i32
    return %c0_i32, %c0_i32_0 : i32, i32
  }
  func.func @transform_9(%arg0: i32, %arg1: memref<1xi32, #tpu.memory_space<smem>>) -> (i32, i32) {
    %c0_i32 = arith.constant 0 : i32
    %c0_i32_0 = arith.constant 0 : i32
    return %arg0, %c0_i32 : i32, i32
  }
}

</mosaic_0001>

<bundles_post_ra>
// kernel: tpu_custom_call.1
= control target key start
LH: loop header
LB: loop body
LE: loop exit
PB: predicated region body
PF: predicated region fallthrough
CT: control target
= control target key end

     0   :  { %16 = vsyncpa [#allocation5], 0  ;;  %s3264_s0 = inlined_call_operand.<no memory space> [shape: s32[1], index: 0, kind: input, shape index: {}]   ;;  %s3265_s1 = inlined_call_operand.vmem [shape: f32[2,1024], index: 1, kind: input, shape index: {}]   ;;  %s3266_s2 = inlined_call_operand.hbm [shape: bf16[1024,256], index: 2, kind: input, shape index: {}]   ;;  %s3267_s3 = inlined_call_operand.vmem [shape: f32[1,256], index: 3, kind: input, shape index: {}]   ;;  %s3268_s4 = inlined_call_operand.vmem [shape: bf16[256,64], index: 4, kind: input, shape index: {}]   ;;  %s3269_s5 = inlined_call_operand.vmem [shape: f32[1,64], index: 5, kind: input, shape index: {}]   ;;  %s3270_s6 = inlined_call_operand.vmem [shape: bf16[64,256], index: 6, kind: input, shape index: {}]   ;;  %s3271_s7 = inlined_call_operand.vmem [shape: f32[1,256], index: 7, kind: input, shape index: {}]   ;;  %s3272_s8 = inlined_call_operand.hbm [shape: bf16[256,1024], index: 8, kind: input, shape index: {}]   ;;  %s3273_s9 = inlined_call_operand.vmem [shape: f32[1,1024], index: 9, kind: input, shape index: {}]   ;;  %s3274_s10 = inlined_call_operand.hbm [shape: f32[2,1024], index: 10, kind: output, shape index: {}]  }
   0x1   :  { %17 = vsyncpa [#allocation8], 0 }
   0x2   :  { %18 = vsyncpa [#allocation6], 0  ;;  %s3008_s12 = smov [#allocation4]   ;;  %s2936_s16 = scalar_lea.hbm %s3266_s2, 16384 }
   0x3   :  { %s26_s13 = sshll.u32 %s3008_s12, 4  ;;  %p2937_p0 = scmp.ne.s32.totalorder %s3266_s2, %s2936_s16  ;;  %s27_s13 = int_to_ptr.vmem [resolvable:$true] %s26_s13 }
   0x4   :  { %p2940_p1 = scmp.lt.u32.totalorder %s2936_s16, %s3266_s2 }
   0x6   :  { %p2942_p2 = pnand %p2940_p1, %p2937_p0 }
   0x8   :  { %2945 = shalt.err (!%p2942_p2)
}
   0x9   :  { %s2946_s21 = scalar_lea.vmem %s27_s13, 16384  ;;  %p2951_p4 = scmp.lt.s32.totalorder %s27_s13, %s27_s13 }
   0xa   :  { %p2947_p3 = scmp.ne.s32.totalorder %s27_s13, %s2946_s21  ;;  %p2952_p5 = scmp.lt.s32.totalorder %s2946_s21, %s2946_s21 }
   0xc   :  { %p2953_p6 = por %p2952_p5, %p2951_p4 }
   0xe   :  { %p2954_p7 = pnand %p2953_p6, %p2947_p3 }
  0x10   :  { %2957 = shalt.err (!%p2954_p7)
}
  0x11   :  { %s3009_s22 = smov 128   ;;  %s3010_s23 = smov 8  }
  0x12   :  { %32 = dma.hbm_to_vmem [thread:$0]  %s3266_s2, 16384, %s27_s13, [#allocation5], %s3009_s22, %s3009_s22, %s3010_s23  }
  0x13   :  { %s3011_s0 = smov [#allocation7]   ;;  %s2958_s29 = scalar_lea.hbm %s3272_s8, 16384 }
  0x14   :  { %s48_s26 = sshll.u32 %s3011_s0, 4  ;;  %p2959_p8 = scmp.ne.s32.totalorder %s3272_s8, %s2958_s29  ;;  %s49_s26 = int_to_ptr.vmem [resolvable:$true] %s48_s26 }
  0x15   :  { %p2962_p9 = scmp.lt.u32.totalorder %s2958_s29, %s3272_s8 }
  0x17   :  { %p2964_p10 = pnand %p2962_p9, %p2959_p8 }
  0x19   :  { %2967 = shalt.err (!%p2964_p10)
}
  0x1a   :  { %s2968_s15 = scalar_lea.vmem %s49_s26, 16384  ;;  %p2973_p12 = scmp.lt.s32.totalorder %s49_s26, %s49_s26 }
  0x1b   :  { %p2969_p11 = scmp.ne.s32.totalorder %s49_s26, %s2968_s15  ;;  %p2974_p13 = scmp.lt.s32.totalorder %s2968_s15, %s2968_s15 }
  0x1d   :  { %p2975_p0 = por %p2974_p13, %p2973_p12 }
  0x1f   :  { %p2976_p1 = pnand %p2975_p0, %p2969_p11 }
  0x21   :  { %2979 = shalt.err (!%p2976_p1)
}
  0x22   :  { %s3012_s2 = smov 512   ;;  %s3013_s13 = smov 32  }
  0x23   :  { %54 = dma.hbm_to_vmem [thread:$0]  %s3272_s8, 16384, %s49_s26, [#allocation8], %s3012_s2, %s3012_s2, %s3013_s13  }
  0x24   :  { %3002 = dma.done.wait [#allocation5], 16384  }
  0x25   :  { %3003 = vsyncadd [#allocation5], 4294950912 }
  0x26   :  { %3004 = dma.done.wait [#allocation8], 16384  }
  0x27   :  { %3005 = vsyncadd [#allocation8], 4294950912  ;;  %v2714_v0 = vld [vmem:[#allocation4 + $0x4] ss:$8 sps:$4 sm:$0xff]   ;;  %v2716_v1 = vld [vmem:[#allocation4] ss:$8 sps:$4 sm:$0xff]   ;;  %v72_v9 = vlaneseq }
  0x28   :  { %898 = vmatprep.subr.bf16.mxu0 %v2714_v0  ;;  %v2717_v2 = vld [vmem:[#allocation4 + $0x14] ss:$8 sps:$4 sm:$0xff]   ;;  %v2719_v3 = vld [vmem:[#allocation4 + $0x10] ss:$8 sps:$4 sm:$0xff]   ;;  %v2720_v4 = vld [vmem:[#allocation4 + $0x24] ss:$8 sps:$4 sm:$0xff]  }
  0x29   :  { %899 = vmatpush1.bf16.msra.mxu0 %v2716_v1  ;;  %v2722_v5 = vld [vmem:[#allocation4 + $0x20] ss:$8 sps:$4 sm:$0xff]   ;;  %v2723_v6 = vld [vmem:[#allocation4 + $0x34] ss:$8 sps:$4 sm:$0xff]   ;;  %v3014_v7 = vmov 1983009808  }
  0x2a   :  { %900 = vmatprep.subr.bf16.mxu0 %v2717_v2  ;;  %v70_v8 = vunpack.c.l.s4 %v3014_v7  ;;  %v2725_v10 = vld [vmem:[#allocation4 + $0x30] ss:$8 sps:$4 sm:$0xff]   ;;  %v2726_v11 = vld [vmem:[#allocation4 + $0x44] ss:$8 sps:$4 sm:$0xff]   ;;  %v3096_v13 = vshrl.u32 %v72_v9, 7  ;;  %vm1302_vm0 = vcmask 523264  }
  0x2b   :  { %v2728_v14 = vld [vmem:[#allocation4 + $0x40] ss:$8 sps:$4 sm:$0xff]   ;;  %v2729_v15 = vld [vmem:[#allocation4 + $0x54] ss:$8 sps:$4 sm:$0xff]   ;;  %v2731_v17 = vld [vmem:[#allocation4 + $0x50] ss:$8 sps:$4 sm:$0xff]  }
  0x2c   :  { %v71_v12 = vunpack.c.0.s8 %v70_v8  ;;  %v2732_v18 = vld [vmem:[#allocation4 + $0x64] ss:$8 sps:$4 sm:$0xff]   ;;  %v2734_v21 = vld [vmem:[#allocation4 + $0x60] ss:$8 sps:$4 sm:$0xff]   ;;  %v2735_v22 = vld [vmem:[#allocation4 + $0x74] ss:$8 sps:$4 sm:$0xff]  }
  0x2d   :  { %901 = vmatpush1.bf16.msra.mxu0 %v2719_v3  ;;  %v64_v19 = vld [vmem:[%s3265_s1] sm:$0xff]  ;;  %v2737_v25 = vld [vmem:[#allocation4 + $0x70] ss:$8 sps:$4 sm:$0xff]   ;;  %v2741_v28 = vld [vmem:[#allocation4 + $0x94] ss:$8 sps:$4 sm:$0xff]  }
  0x2e   :  { %902 = vmatprep.subr.bf16.mxu0 %v2720_v4  ;;  %v3099_v16 = vsub.s32 %v71_v12, %v3096_v13  ;;  %v2738_v26 = vld [vmem:[#allocation4 + $0x84] ss:$8 sps:$4 sm:$0xff]   ;;  %v2740_v27 = vld [vmem:[#allocation4 + $0x80] ss:$8 sps:$4 sm:$0xff]   ;;  %v2743_v29 = vld [vmem:[#allocation4 + $0x90] ss:$8 sps:$4 sm:$0xff]   ;;  %v68_v38 = vcombine.high %v64_v19, %v64_v19 }
  0x2f   :  { %v2744_v30 = vld [vmem:[#allocation4 + $0xa4] ss:$8 sps:$4 sm:$0xff]   ;;  %v2746_v31 = vld [vmem:[#allocation4 + $0xa0] ss:$8 sps:$4 sm:$0xff]   ;;  %v2747_v32 = vld [vmem:[#allocation4 + $0xb4] ss:$8 sps:$4 sm:$0xff]  }
  0x30   :  { %v75_v20 = vrot.slane %v64_v19, %v3099_v16  ;;  %v2749_v33 = vld [vmem:[#allocation4 + $0xb0] ss:$8 sps:$4 sm:$0xff]   ;;  %v2750_v34 = vld [vmem:[#allocation4 + $0xc4] ss:$8 sps:$4 sm:$0xff]   ;;  %v2752_v35 = vld [vmem:[#allocation4 + $0xc0] ss:$8 sps:$4 sm:$0xff]   ;;  %v3106_v41 = vrot.slane %v68_v38, %v3099_v16 }
  0x31   :  { %903 = vmatpush1.bf16.msra.mxu0 %v2722_v5  ;;  %v2753_v36 = vld [vmem:[#allocation4 + $0xd4] ss:$8 sps:$4 sm:$0xff]   ;;  %v2755_v37 = vld [vmem:[#allocation4 + $0xd0] ss:$8 sps:$4 sm:$0xff]   ;;  %v2756_v39 = vld [vmem:[#allocation4 + $0xe4] ss:$8 sps:$4 sm:$0xff]  }
  0x32   :  { %904 = vmatprep.subr.bf16.mxu0 %v2723_v6  ;;  %v83_v23 = vcombine.high %v75_v20, %v75_v20  ;;  %v2758_v40 = vld [vmem:[#allocation4 + $0xe0] ss:$8 sps:$4 sm:$0xff]   ;;  %v2759_v42 = vld [vmem:[#allocation4 + $0xf4] ss:$8 sps:$4 sm:$0xff]   ;;  %v2761_v43 = vld [vmem:[#allocation4 + $0xf0] ss:$8 sps:$4 sm:$0xff]   ;;  %v84_v44 = vcombine.high %v3106_v41, %v3106_v41  ;;  %v110_v46 = vpack.c.bf16 %v75_v20, %v75_v20 }
  0x33   :  { %v2765_v45 = vld [vmem:[#allocation4 + $0x104] ss:$8 sps:$4 sm:$0xff]   ;;  %v2763_v47 = vld [vmem:[#allocation4 + $0x100] ss:$8 sps:$4 sm:$0xff]   ;;  %v2768_v49 = vld [vmem:[#allocation4 + $0x114] ss:$8 sps:$4 sm:$0xff]  }
  0x34   :  { %v111_v24 = vpack.c.bf16 %v83_v23, %v83_v23  ;;  %v113_v48 = vpack.c.bf16 %v84_v44, %v84_v44  ;;  %v2766_v50 = vld [vmem:[#allocation4 + $0x110] ss:$8 sps:$4 sm:$0xff]   ;;  %v2771_v51 = vld [vmem:[#allocation4 + $0x124] ss:$8 sps:$4 sm:$0xff]   ;;  %v2769_v52 = vld [vmem:[#allocation4 + $0x120] ss:$8 sps:$4 sm:$0xff]  }
  0x35   :  { %905 = vmatpush1.bf16.msra.mxu0 %v2725_v10  ;;  %v2774_v53 = vld [vmem:[#allocation4 + $0x134] ss:$8 sps:$4 sm:$0xff]   ;;  %v2772_v54 = vld [vmem:[#allocation4 + $0x130] ss:$8 sps:$4 sm:$0xff]   ;;  %v2777_v55 = vld [vmem:[#allocation4 + $0x144] ss:$8 sps:$4 sm:$0xff]  }
  0x36   :  { %906 = vmatprep.subr.bf16.mxu0 %v2726_v11  ;;  %930 = vmatprep.mubr.bf16.mxu0 %v111_v24  ;;  %v2775_v56 = vld [vmem:[#allocation4 + $0x140] ss:$8 sps:$4 sm:$0xff]   ;;  %v2780_v57 = vld [vmem:[#allocation4 + $0x154] ss:$8 sps:$4 sm:$0xff]   ;;  %v2778_v58 = vld [vmem:[#allocation4 + $0x150] ss:$8 sps:$4 sm:$0xff]  }
  0x37   :  { %v2783_v59 = vld [vmem:[#allocation4 + $0x164] ss:$8 sps:$4 sm:$0xff]   ;;  %v2781_v60 = vld [vmem:[#allocation4 + $0x160] ss:$8 sps:$4 sm:$0xff]   ;;  %v2786_v61 = vld [vmem:[#allocation4 + $0x174] ss:$8 sps:$4 sm:$0xff]  }
  0x38   :  { %v2784_v62 = vld [vmem:[#allocation4 + $0x170] ss:$8 sps:$4 sm:$0xff]   ;;  %v2789_v63 = vld [vmem:[#allocation4 + $0x184] ss:$8 sps:$4 sm:$0xff]   ;;  %v2787_v0 = vld [vmem:[#allocation4 + $0x180] ss:$8 sps:$4 sm:$0xff]  }
  0x39   :  { %907 = vmatpush1.bf16.msra.mxu0 %v2728_v14  ;;  %v2792_v1 = vld [vmem:[#allocation4 + $0x194] ss:$8 sps:$4 sm:$0xff]   ;;  %v2790_v2 = vld [vmem:[#allocation4 + $0x190] ss:$8 sps:$4 sm:$0xff]   ;;  %v2795_v3 = vld [vmem:[#allocation4 + $0x1a4] ss:$8 sps:$4 sm:$0xff]  }
  0x3a   :  { %908 = vmatprep.subr.bf16.mxu0 %v2729_v15  ;;  %v2793_v4 = vld [vmem:[#allocation4 + $0x1a0] ss:$8 sps:$4 sm:$0xff]   ;;  %v2798_v5 = vld [vmem:[#allocation4 + $0x1b4] ss:$8 sps:$4 sm:$0xff]   ;;  %v2796_v6 = vld [vmem:[#allocation4 + $0x1b0] ss:$8 sps:$4 sm:$0xff]  }
  0x3b   :  { %v2801_v7 = vld [vmem:[#allocation4 + $0x1c4] ss:$8 sps:$4 sm:$0xff]   ;;  %v2799_v8 = vld [vmem:[#allocation4 + $0x1c0] ss:$8 sps:$4 sm:$0xff]   ;;  %v2804_v9 = vld [vmem:[#allocation4 + $0x1d4] ss:$8 sps:$4 sm:$0xff]  }
  0x3c   :  { %v2802_v10 = vld [vmem:[#allocation4 + $0x1d0] ss:$8 sps:$4 sm:$0xff]   ;;  %v2807_v11 = vld [vmem:[#allocation4 + $0x1e4] ss:$8 sps:$4 sm:$0xff]   ;;  %v2805_v14 = vld [vmem:[#allocation4 + $0x1e0] ss:$8 sps:$4 sm:$0xff]  }
  0x3d   :  { %909 = vmatpush1.bf16.msra.mxu0 %v2731_v17  ;;  %v3113_v12 = vld [vmem:[%s3265_s1 + $0x8] sm:$0xff]  ;;  %v2810_v17 = vld [vmem:[#allocation4 + $0x1f4] ss:$8 sps:$4 sm:$0xff]  }
  0x3e   :  { %910 = vmatprep.subr.bf16.mxu0 %v2732_v18  ;;  %v3117_v15 = vrot.slane %v3113_v12, %v3099_v16  ;;  %v2808_v18 = vld [vmem:[#allocation4 + $0x1f0] ss:$8 sps:$4 sm:$0xff]   ;;  %v2813_v20 = vld [vmem:[#allocation4 + $0x204] ss:$8 sps:$4 sm:$0xff]   ;;  %v2816_v24 = vld [vmem:[#allocation4 + $0x214] ss:$8 sps:$4 sm:$0xff]  }
  0x3f   :  { %v2837_v38 = vld [vmem:[#allocation4 + $0x284] ss:$8 sps:$4 sm:$0xff]   ;;  %v2846_v44 = vld [vmem:[#allocation4 + $0x2b4] ss:$8 sps:$4 sm:$0xff]  }
  0x40   :  { %v100_v19 = vcombine.high %v3117_v15, %v3117_v15 }
  0x41   :  { %911 = vmatpush1.bf16.msra.mxu0 %v2734_v21  ;;  %v112_v21 = vpack.c.bf16 %v3106_v41, %v3106_v41  ;;  %v2838_v41 = vld [vmem:[#allocation4 + $0x290] ss:$8 sps:$4 sm:$0xff]  }
  0x42   :  { %912 = vmatprep.subr.bf16.mxu0 %v2735_v22  ;;  %v2811_v22 = vld [vmem:[#allocation4 + $0x200] ss:$8 sps:$4 sm:$0xff]   ;;  %v115_v23 = vpack.c.bf16 %v100_v19, %v100_v19  ;;  %v2894_v19 = vld [vmem:[#allocation4 + $0x3b4] ss:$8 sps:$4 sm:$0xff]  }
  0x45   :  { %913 = vmatpush1.bf16.msra.mxu0 %v2737_v25  ;;  %v2814_v25 = vld [vmem:[#allocation4 + $0x210] ss:$8 sps:$4 sm:$0xff]  }
  0x46   :  { %914 = vmatprep.subr.bf16.mxu0 %v2738_v26  ;;  %v2819_v26 = vld [vmem:[#allocation4 + $0x224] ss:$8 sps:$4 sm:$0xff]  }
  0x49   :  { %915 = vmatpush1.bf16.msra.mxu0 %v2740_v27  ;;  %v2817_v27 = vld [vmem:[#allocation4 + $0x220] ss:$8 sps:$4 sm:$0xff]  }
  0x4a   :  { %916 = vmatprep.subr.bf16.mxu0 %v2741_v28  ;;  %v2822_v28 = vld [vmem:[#allocation4 + $0x234] ss:$8 sps:$4 sm:$0xff]  }
  0x4d   :  { %917 = vmatpush1.bf16.msra.mxu0 %v2743_v29  ;;  %v2820_v29 = vld [vmem:[#allocation4 + $0x230] ss:$8 sps:$4 sm:$0xff]  }
  0x4e   :  { %918 = vmatprep.subr.bf16.mxu0 %v2744_v30  ;;  %v2825_v30 = vld [vmem:[#allocation4 + $0x244] ss:$8 sps:$4 sm:$0xff]  }
  0x51   :  { %919 = vmatpush1.bf16.msra.mxu0 %v2746_v31  ;;  %v2823_v31 = vld [vmem:[#allocation4 + $0x240] ss:$8 sps:$4 sm:$0xff]  }
  0x52   :  { %920 = vmatprep.subr.bf16.mxu0 %v2747_v32  ;;  %v2828_v32 = vld [vmem:[#allocation4 + $0x254] ss:$8 sps:$4 sm:$0xff]  }
  0x55   :  { %921 = vmatpush1.bf16.msra.mxu0 %v2749_v33  ;;  %v2826_v33 = vld [vmem:[#allocation4 + $0x250] ss:$8 sps:$4 sm:$0xff]  }
  0x56   :  { %922 = vmatprep.subr.bf16.mxu0 %v2750_v34  ;;  %v2831_v34 = vld [vmem:[#allocation4 + $0x264] ss:$8 sps:$4 sm:$0xff]  }
  0x59   :  { %923 = vmatpush1.bf16.msra.mxu0 %v2752_v35  ;;  %v2829_v35 = vld [vmem:[#allocation4 + $0x260] ss:$8 sps:$4 sm:$0xff]  }
  0x5a   :  { %924 = vmatprep.subr.bf16.mxu0 %v2753_v36  ;;  %v2834_v36 = vld [vmem:[#allocation4 + $0x274] ss:$8 sps:$4 sm:$0xff]  }
  0x5d   :  { %925 = vmatpush1.bf16.msra.mxu0 %v2755_v37  ;;  %v2832_v37 = vld [vmem:[#allocation4 + $0x270] ss:$8 sps:$4 sm:$0xff]  }
  0x5e   :  { %926 = vmatprep.subr.bf16.mxu0 %v2756_v39  ;;  %v2835_v39 = vld [vmem:[#allocation4 + $0x280] ss:$8 sps:$4 sm:$0xff]  }
  0x61   :  { %927 = vmatpush1.bf16.msra.mxu0 %v2758_v40  ;;  %v2840_v40 = vld [vmem:[#allocation4 + $0x294] ss:$8 sps:$4 sm:$0xff]  }
  0x62   :  { %928 = vmatprep.subr.bf16.mxu0 %v2759_v42  ;;  %v2843_v42 = vld [vmem:[#allocation4 + $0x2a4] ss:$8 sps:$4 sm:$0xff]  }
  0x65   :  { %929 = vmatpush1.bf16.msra.mxu0 %v2761_v43  ;;  %v2841_v43 = vld [vmem:[#allocation4 + $0x2a0] ss:$8 sps:$4 sm:$0xff]  }
  0x66   :  { %939 = vmatprep.subr.bf16.mxu0 %v2765_v45  ;;  %v2844_v45 = vld [vmem:[#allocation4 + $0x2b0] ss:$8 sps:$4 sm:$0xff]  }
  0x68   :  { %931 = vmatmul.mubr.bf16.vlgmr.msra.gmra.mrb[0].mxu0 %v110_v46  ;;  %v2849_v46 = vld [vmem:[#allocation4 + $0x2c4] ss:$8 sps:$4 sm:$0xff]  }
  0x69   :  { %940 = vmatpush1.bf16.msra.mxu0 %v2763_v47  ;;  %971 = vmatprep.mubr.bf16.mxu0 %v113_v48  ;;  %v2847_v47 = vld [vmem:[#allocation4 + $0x2c0] ss:$8 sps:$4 sm:$0xff]   ;;  %v2852_v48 = vld [vmem:[#allocation4 + $0x2d4] ss:$8 sps:$4 sm:$0xff]  }
  0x6a   :  { %941 = vmatprep.subr.bf16.mxu0 %v2768_v49  ;;  %v2850_v49 = vld [vmem:[#allocation4 + $0x2d0] ss:$8 sps:$4 sm:$0xff]  }
  0x6d   :  { %942 = vmatpush1.bf16.msra.mxu0 %v2766_v50  ;;  %v85_v50 = vcombine.high %v3113_v12, %v3113_v12  ;;  %v2883_v12 = vld [vmem:[#allocation4 + $0x380] ss:$8 sps:$4 sm:$0xff]  }
  0x6e   :  { %943 = vmatprep.subr.bf16.mxu0 %v2771_v51  ;;  %v2855_v51 = vld [vmem:[#allocation4 + $0x2e4] ss:$8 sps:$4 sm:$0xff]  }
  0x71   :  { %944 = vmatpush1.bf16.msra.mxu0 %v2769_v52  ;;  %v2853_v52 = vld [vmem:[#allocation4 + $0x2e0] ss:$8 sps:$4 sm:$0xff]  }
  0x72   :  { %945 = vmatprep.subr.bf16.mxu0 %v2774_v53  ;;  %v3126_v53 = vrot.slane %v85_v50, %v3099_v16  ;;  %v3195_v50 = vsub.s32 0, %v3096_v13 }
  0x75   :  { %946 = vmatpush1.bf16.msra.mxu0 %v2772_v54  ;;  %v2858_v54 = vld [vmem:[#allocation4 + $0x2f4] ss:$8 sps:$4 sm:$0xff]  }
  0x76   :  { %947 = vmatprep.subr.bf16.mxu0 %v2777_v55  ;;  %v2856_v55 = vld [vmem:[#allocation4 + $0x2f0] ss:$8 sps:$4 sm:$0xff]  }
  0x79   :  { %948 = vmatpush1.bf16.msra.mxu0 %v2775_v56  ;;  %v101_v56 = vcombine.high %v3126_v53, %v3126_v53 }
  0x7a   :  { %949 = vmatprep.subr.bf16.mxu0 %v2780_v57  ;;  %v2861_v57 = vld [vmem:[#allocation4 + $0x304] ss:$8 sps:$4 sm:$0xff]  }
  0x7d   :  { %950 = vmatpush1.bf16.msra.mxu0 %v2778_v58  ;;  %v114_v58 = vpack.c.bf16 %v3117_v15, %v3117_v15  ;;  %v2886_v15 = vld [vmem:[#allocation4 + $0x390] ss:$8 sps:$4 sm:$0xff]  }
  0x7e   :  { %951 = vmatprep.subr.bf16.mxu0 %v2783_v59  ;;  %v2859_v59 = vld [vmem:[#allocation4 + $0x300] ss:$8 sps:$4 sm:$0xff]  }
  0x81   :  { %952 = vmatpush1.bf16.msra.mxu0 %v2781_v60  ;;  %v117_v60 = vpack.c.bf16 %v101_v56, %v101_v56 }
  0x82   :  { %953 = vmatprep.subr.bf16.mxu0 %v2786_v61  ;;  %v2864_v61 = vld [vmem:[#allocation4 + $0x314] ss:$8 sps:$4 sm:$0xff]  }
  0x85   :  { %954 = vmatpush1.bf16.msra.mxu0 %v2784_v62  ;;  %v2862_v62 = vld [vmem:[#allocation4 + $0x310] ss:$8 sps:$4 sm:$0xff]  }
  0x86   :  { %955 = vmatprep.subr.bf16.mxu0 %v2789_v63  ;;  %v2867_v63 = vld [vmem:[#allocation4 + $0x324] ss:$8 sps:$4 sm:$0xff]  }
  0x89   :  { %956 = vmatpush1.bf16.msra.mxu0 %v2787_v0  ;;  %v2865_v0 = vld [vmem:[#allocation4 + $0x320] ss:$8 sps:$4 sm:$0xff]  }
  0x8a   :  { %957 = vmatprep.subr.bf16.mxu0 %v2792_v1  ;;  %v2870_v1 = vld [vmem:[#allocation4 + $0x334] ss:$8 sps:$4 sm:$0xff]  }
  0x8d   :  { %958 = vmatpush1.bf16.msra.mxu0 %v2790_v2  ;;  %v2868_v2 = vld [vmem:[#allocation4 + $0x330] ss:$8 sps:$4 sm:$0xff]  }
  0x8e   :  { %959 = vmatprep.subr.bf16.mxu0 %v2795_v3  ;;  %v2873_v3 = vld [vmem:[#allocation4 + $0x344] ss:$8 sps:$4 sm:$0xff]  }
  0x91   :  { %960 = vmatpush1.bf16.msra.mxu0 %v2793_v4  ;;  %v2871_v4 = vld [vmem:[#allocation4 + $0x340] ss:$8 sps:$4 sm:$0xff]  }
  0x92   :  { %961 = vmatprep.subr.bf16.mxu0 %v2798_v5  ;;  %v2876_v5 = vld [vmem:[#allocation4 + $0x354] ss:$8 sps:$4 sm:$0xff]  }
  0x95   :  { %962 = vmatpush1.bf16.msra.mxu0 %v2796_v6  ;;  %v2874_v6 = vld [vmem:[#allocation4 + $0x350] ss:$8 sps:$4 sm:$0xff]  }
  0x96   :  { %963 = vmatprep.subr.bf16.mxu0 %v2801_v7  ;;  %v2879_v7 = vld [vmem:[#allocation4 + $0x364] ss:$8 sps:$4 sm:$0xff]  }
  0x99   :  { %964 = vmatpush1.bf16.msra.mxu0 %v2799_v8  ;;  %v2877_v8 = vld [vmem:[#allocation4 + $0x360] ss:$8 sps:$4 sm:$0xff]  }
  0x9a   :  { %965 = vmatprep.subr.bf16.mxu0 %v2804_v9  ;;  %v2882_v9 = vld [vmem:[#allocation4 + $0x374] ss:$8 sps:$4 sm:$0xff]  }
  0x9d   :  { %966 = vmatpush1.bf16.msra.mxu0 %v2802_v10  ;;  %v2880_v10 = vld [vmem:[#allocation4 + $0x370] ss:$8 sps:$4 sm:$0xff]  }
  0x9e   :  { %967 = vmatprep.subr.bf16.mxu0 %v2807_v11  ;;  %v2885_v11 = vld [vmem:[#allocation4 + $0x384] ss:$8 sps:$4 sm:$0xff]  }
  0xa1   :  { %968 = vmatpush1.bf16.msra.mxu0 %v2805_v14  ;;  %v2888_v14 = vld [vmem:[#allocation4 + $0x394] ss:$8 sps:$4 sm:$0xff]  }
  0xa2   :  { %969 = vmatprep.subr.bf16.mxu0 %v2810_v17  ;;  %v2891_v17 = vld [vmem:[#allocation4 + $0x3a4] ss:$8 sps:$4 sm:$0xff]  }
  0xa5   :  { %970 = vmatpush1.bf16.msra.mxu0 %v2808_v18  ;;  %v2889_v18 = vld [vmem:[#allocation4 + $0x3a0] ss:$8 sps:$4 sm:$0xff]  }
  0xa6   :  { %980 = vmatprep.subr.bf16.mxu0 %v2813_v20  ;;  %v2892_v20 = vld [vmem:[#allocation4 + $0x3b0] ss:$8 sps:$4 sm:$0xff]  }
  0xa8   :  { %972 = vmatmul.mubr.bf16.vlgmr.msra.gmra.mrb[0].mxu0 %v112_v21  ;;  %v2897_v21 = vld [vmem:[#allocation4 + $0x3c4] ss:$8 sps:$4 sm:$0xff]  }
  0xa9   :  { %981 = vmatpush1.bf16.msra.mxu0 %v2811_v22  ;;  %1012 = vmatprep.mubr.bf16.mxu0 %v115_v23  ;;  %v2895_v22 = vld [vmem:[#allocation4 + $0x3c0] ss:$8 sps:$4 sm:$0xff]   ;;  %v2900_v23 = vld [vmem:[#allocation4 + $0x3d4] ss:$8 sps:$4 sm:$0xff]  }
  0xaa   :  { %982 = vmatprep.subr.bf16.mxu0 %v2816_v24  ;;  %v2898_v24 = vld [vmem:[#allocation4 + $0x3d0] ss:$8 sps:$4 sm:$0xff]  }
  0xad   :  { %983 = vmatpush1.bf16.msra.mxu0 %v2814_v25  ;;  %v2903_v25 = vld [vmem:[#allocation4 + $0x3e4] ss:$8 sps:$4 sm:$0xff]  }
  0xae   :  { %984 = vmatprep.subr.bf16.mxu0 %v2819_v26  ;;  %v2901_v26 = vld [vmem:[#allocation4 + $0x3e0] ss:$8 sps:$4 sm:$0xff]  }
  0xb1   :  { %985 = vmatpush1.bf16.msra.mxu0 %v2817_v27  ;;  %v2906_v27 = vld [vmem:[#allocation4 + $0x3f4] ss:$8 sps:$4 sm:$0xff]  }
  0xb2   :  { %986 = vmatprep.subr.bf16.mxu0 %v2822_v28  ;;  %v2904_v28 = vld [vmem:[#allocation4 + $0x3f0] ss:$8 sps:$4 sm:$0xff]  }
  0xb5   :  { %987 = vmatpush1.bf16.msra.mxu0 %v2820_v29  ;;  %v2908_v29 = vld [vmem:[%s3268_s4 + $0x40] sm:$0xff]  }
  0xb6   :  { %988 = vmatprep.subr.bf16.mxu0 %v2825_v30  ;;  %v116_v30 = vpack.c.bf16 %v3126_v53, %v3126_v53 }
  0xb9   :  { %989 = vmatpush1.bf16.msra.mxu0 %v2823_v31  ;;  %v2909_v31 = vld [vmem:[%s3268_s4] sm:$0xff]  }
  0xba   :  { %990 = vmatprep.subr.bf16.mxu0 %v2828_v32  ;;  %v2910_v32 = vld [vmem:[%s3268_s4 + $0x48] sm:$0xff]  }
  0xbd   :  { %991 = vmatpush1.bf16.msra.mxu0 %v2826_v33  ;;  %v2911_v33 = vld [vmem:[%s3268_s4 + $0x8] sm:$0xff]  }
  0xbe   :  { %992 = vmatprep.subr.bf16.mxu0 %v2831_v34  ;;  %v2912_v34 = vld [vmem:[%s3268_s4 + $0x50] sm:$0xff]  }
  0xc1   :  { %993 = vmatpush1.bf16.msra.mxu0 %v2829_v35  ;;  %v2913_v35 = vld [vmem:[%s3268_s4 + $0x10] sm:$0xff]  }
  0xc2   :  { %994 = vmatprep.subr.bf16.mxu0 %v2834_v36  ;;  %v2914_v36 = vld [vmem:[%s3268_s4 + $0x58] sm:$0xff]  }
  0xc5   :  { %995 = vmatpush1.bf16.msra.mxu0 %v2832_v37  ;;  %v2915_v37 = vld [vmem:[%s3268_s4 + $0x18] sm:$0xff]  }
  0xc6   :  { %996 = vmatprep.subr.bf16.mxu0 %v2837_v38  ;;  %v2916_v38 = vld [vmem:[%s3268_s4 + $0x60] sm:$0xff]  }
  0xc9   :  { %997 = vmatpush1.bf16.msra.mxu0 %v2835_v39  ;;  %v2917_v39 = vld [vmem:[%s3268_s4 + $0x20] sm:$0xff]  }
  0xca   :  { %998 = vmatprep.subr.bf16.mxu0 %v2840_v40  ;;  %v2918_v40 = vld [vmem:[%s3268_s4 + $0x68] sm:$0xff]  }
  0xcd   :  { %999 = vmatpush1.bf16.msra.mxu0 %v2838_v41  ;;  %v2919_v41 = vld [vmem:[%s3268_s4 + $0x28] sm:$0xff]  }
  0xce   :  { %1000 = vmatprep.subr.bf16.mxu0 %v2843_v42  ;;  %v2920_v42 = vld [vmem:[%s3268_s4 + $0x70] sm:$0xff]  }
  0xd1   :  { %1001 = vmatpush1.bf16.msra.mxu0 %v2841_v43  ;;  %v2921_v43 = vld [vmem:[%s3268_s4 + $0x30] sm:$0xff]  }
  0xd2   :  { %1002 = vmatprep.subr.bf16.mxu0 %v2846_v44  ;;  %v2922_v44 = vld [vmem:[%s3268_s4 + $0x78] sm:$0xff]  }
  0xd5   :  { %1003 = vmatpush1.bf16.msra.mxu0 %v2844_v45  ;;  %v2923_v45 = vld [vmem:[%s3268_s4 + $0x38] sm:$0xff]  }
  0xd6   :  { %1004 = vmatprep.subr.bf16.mxu0 %v2849_v46  ;;  %v2924_v46 = vld [vmem:[%s3270_s6 + $0x4] ss:$8 sps:$4 sm:$0xff]  }
  0xd7   :  { %1306 = vmatprep.subr.bf16.mxu1 %v2924_v46 }
  0xd9   :  { %1005 = vmatpush1.bf16.msra.mxu0 %v2847_v47  ;;  %v2926_v47 = vld [vmem:[%s3270_s6] ss:$8 sps:$4 sm:$0xff]  }
  0xda   :  { %1006 = vmatprep.subr.bf16.mxu0 %v2852_v48  ;;  %v2927_v48 = vld [vmem:[%s3270_s6 + $0x14] ss:$8 sps:$4 sm:$0xff]   ;;  %1307 = vmatpush1.bf16.msra.mxu1 %v2926_v47  ;;  %v1415_v47 = vld [vmem:[#allocation7 + $0x200] sm:$0xff] }
  0xdb   :  { %1308 = vmatprep.subr.bf16.mxu1 %v2927_v48  ;;  %v1419_v48 = vld [vmem:[#allocation7 + $0x220] sm:$0xff] }
  0xdd   :  { %1007 = vmatpush1.bf16.msra.mxu0 %v2850_v49  ;;  %v2929_v49 = vld [vmem:[%s3270_s6 + $0x10] ss:$8 sps:$4 sm:$0xff]  }
  0xde   :  { %1008 = vmatprep.subr.bf16.mxu0 %v2855_v51  ;;  %1309 = vmatpush1.bf16.msra.mxu1 %v2929_v49  ;;  %v246_v51 = vld [vmem:[%s3267_s3] sm:$0x3] }
  0xdf   :  { %v251_v53 = vrot.slane %v246_v51, %v3195_v50 }
  0xe1   :  { %1009 = vmatpush1.bf16.msra.mxu0 %v2853_v52  ;;  %v3201_v52 = vsub.s32 1, %v3096_v13 }
  0xe2   :  { %1010 = vmatprep.subr.bf16.mxu0 %v2858_v54 }
  0xe3   :  { %v255_v54 = vrot.slane %v246_v51, %v3201_v52  ;;  %v2606_v51 = vcombine.high %v1415_v47, %v1419_v48 }
  0xe5   :  { %1011 = vmatpush1.bf16.msra.mxu0 %v2856_v55 }
  0xe6   :  { %1021 = vmatprep.subr.bf16.mxu0 %v2861_v57 }
  0xe8   :  { %1013 = vmatmul.mubr.bf16.vlgmr.msra.gmra.mrb[0].mxu0 %v114_v58 }
  0xe9   :  { %1022 = vmatpush1.bf16.msra.mxu0 %v2859_v59  ;;  %1053 = vmatprep.mubr.bf16.mxu0 %v117_v60 }
  0xea   :  { %1023 = vmatprep.subr.bf16.mxu0 %v2864_v61 }
  0xed   :  { %1024 = vmatpush1.bf16.msra.mxu0 %v2862_v62 }
  0xee   :  { %1025 = vmatprep.subr.bf16.mxu0 %v2867_v63 }
  0xf1   :  { %1026 = vmatpush1.bf16.msra.mxu0 %v2865_v0 }
  0xf2   :  { %1027 = vmatprep.subr.bf16.mxu0 %v2870_v1  ;;  %v2930_v1 = vld [vmem:[%s3270_s6 + $0x24] ss:$8 sps:$4 sm:$0xff]  }
  0xf3   :  { %1310 = vmatprep.subr.bf16.mxu1 %v2930_v1  ;;  %v1447_v1 = vld [vmem:[#allocation7 + $0x300] sm:$0xff] }
  0xf5   :  { %1028 = vmatpush1.bf16.msra.mxu0 %v2868_v2  ;;  %v2932_v2 = vld [vmem:[%s3270_s6 + $0x20] ss:$8 sps:$4 sm:$0xff]  }
  0xf6   :  { %1029 = vmatprep.subr.bf16.mxu0 %v2873_v3  ;;  %1311 = vmatpush1.bf16.msra.mxu1 %v2932_v2  ;;  %v2933_v3 = vld [vmem:[%s3270_s6 + $0x34] ss:$8 sps:$4 sm:$0xff]   ;;  %v1451_v2 = vld [vmem:[#allocation7 + $0x320] sm:$0xff] }
  0xf7   :  { %1312 = vmatprep.subr.bf16.mxu1 %v2933_v3 }
  0xf9   :  { %1030 = vmatpush1.bf16.msra.mxu0 %v2871_v4  ;;  %v2935_v4 = vld [vmem:[%s3270_s6 + $0x30] ss:$8 sps:$4 sm:$0xff]  }
  0xfa   :  { %1031 = vmatprep.subr.bf16.mxu0 %v2876_v5  ;;  %1313 = vmatpush1.bf16.msra.mxu1 %v2935_v4  ;;  %v3015_v5 = vmov 0   ;;  %v2638_v4 = vcombine.high %v1447_v1, %v1451_v2 }
  0xfb   :  { %1338 = vmatprep.mubr.bf16.mxu1 %v3015_v5  ;;  %v1455_v5 = vld [vmem:[#allocation7 + $0x340] sm:$0xff] }
  0xfd   :  { %1032 = vmatpush1.bf16.msra.mxu0 %v2874_v6  ;;  %v1351_v6 = vld [vmem:[#allocation7] sm:$0xff] }
  0xfe   :  { %1033 = vmatprep.subr.bf16.mxu0 %v2879_v7  ;;  %v1355_v7 = vld [vmem:[#allocation7 + $0x20] sm:$0xff] }
 0x101   :  { %1034 = vmatpush1.bf16.msra.mxu0 %v2877_v8  ;;  %v2541_v8 = vcombine.low %v1351_v6, %v1355_v7 }
 0x102   :  { %1035 = vmatprep.subr.bf16.mxu0 %v2882_v9  ;;  %v2542_v9 = vcombine.high %v1351_v6, %v1355_v7  ;;  %v1459_v6 = vld [vmem:[#allocation7 + $0x360] sm:$0xff]  ;;  %v2637_v7 = vcombine.low %v1447_v1, %v1451_v2  ;;  %v1416_v2 = vld [vmem:[#allocation7 + $0x208] sm:$0xff] }
 0x104   :  { %2161 = vmatprep.subr.bf16.mxu1 %v2542_v9  ;;  %v2645_v9 = vcombine.low %v1455_v5, %v1459_v6 }
 0x105   :  { %1036 = vmatpush1.bf16.msra.mxu0 %v2880_v10 }
 0x106   :  { %1037 = vmatprep.subr.bf16.mxu0 %v2885_v11  ;;  %v2515_v11 = vld [vmem:[%s3269_s5] ss:$0 sm:$0xff] }
 0x109   :  { %1038 = vmatpush1.bf16.msra.mxu0 %v2883_v12 }
 0x10a   :  { %1039 = vmatprep.subr.bf16.mxu0 %v2888_v14 }
 0x10d   :  { %1040 = vmatpush1.bf16.msra.mxu0 %v2886_v15 }
 0x10e   :  { %1041 = vmatprep.subr.bf16.mxu0 %v2891_v17 }
 0x111   :  { %1042 = vmatpush1.bf16.msra.mxu0 %v2889_v18  ;;  %v1359_v18 = vld [vmem:[#allocation7 + $0x40] sm:$0xff] }
 0x112   :  { %1043 = vmatprep.subr.bf16.mxu0 %v2894_v19  ;;  %v1363_v19 = vld [vmem:[#allocation7 + $0x60] sm:$0xff] }
 0x115   :  { %1044 = vmatpush1.bf16.msra.mxu0 %v2892_v20 }
 0x116   :  { %1045 = vmatprep.subr.bf16.mxu0 %v2897_v21 }
 0x119   :  { %1046 = vmatpush1.bf16.msra.mxu0 %v2895_v22  ;;  %v2550_v22 = vcombine.high %v1359_v18, %v1363_v19 }
 0x11a   :  { %1047 = vmatprep.subr.bf16.mxu0 %v2900_v23  ;;  %v1367_v23 = vld [vmem:[#allocation7 + $0x80] sm:$0xff] }
 0x11d   :  { %1048 = vmatpush1.bf16.msra.mxu0 %v2898_v24  ;;  %v1371_v24 = vld [vmem:[#allocation7 + $0xa0] sm:$0xff] }
 0x11e   :  { %1049 = vmatprep.subr.bf16.mxu0 %v2903_v25  ;;  %v2549_v25 = vcombine.low %v1359_v18, %v1363_v19 }
 0x121   :  { %1050 = vmatpush1.bf16.msra.mxu0 %v2901_v26  ;;  %v2558_v26 = vcombine.high %v1367_v23, %v1371_v24 }
 0x122   :  { %1051 = vmatprep.subr.bf16.mxu0 %v2906_v27  ;;  %v1375_v27 = vld [vmem:[#allocation7 + $0xc0] sm:$0xff] }
 0x125   :  { %1052 = vmatpush1.bf16.msra.mxu0 %v2904_v28  ;;  %v1379_v28 = vld [vmem:[#allocation7 + $0xe0] sm:$0xff] }
 0x126   :  { %2669 = vmatprep.subr.bf16.mxu0 %v2908_v29  ;;  %v2557_v29 = vcombine.low %v1367_v23, %v1371_v24  ;;  %v1250_v24 = vld [vmem:[%s3271_s7] sm:$0x3] }
 0x128   :  { %1054 = vmatmul.mubr.bf16.vlgmr.msra.gmra.mrb[0].mxu0 %v116_v30  ;;  %v2566_v30 = vcombine.high %v1375_v27, %v1379_v28 }
 0x129   :  { %2670 = vmatpush3.bf16.msra.mxu0 %v2909_v31  ;;  %v1383_v31 = vld [vmem:[#allocation7 + $0x100] sm:$0xff] }
 0x12a   :  { %2671 = vmatprep.subr.bf16.mxu0 %v2910_v32  ;;  %v1387_v32 = vld [vmem:[#allocation7 + $0x120] sm:$0xff] }
 0x12d   :  { %2672 = vmatpush3.bf16.msra.mxu0 %v2911_v33  ;;  %v2565_v33 = vcombine.low %v1375_v27, %v1379_v28 }
 0x12e   :  { %2673 = vmatprep.subr.bf16.mxu0 %v2912_v34  ;;  %v2574_v34 = vcombine.high %v1383_v31, %v1387_v32 }
 0x131   :  { %2674 = vmatpush3.bf16.msra.mxu0 %v2913_v35  ;;  %v1391_v35 = vld [vmem:[#allocation7 + $0x140] sm:$0xff] }
 0x132   :  { %2675 = vmatprep.subr.bf16.mxu0 %v2914_v36  ;;  %v1395_v36 = vld [vmem:[#allocation7 + $0x160] sm:$0xff] }
 0x135   :  { %2676 = vmatpush3.bf16.msra.mxu0 %v2915_v37  ;;  %v2573_v37 = vcombine.low %v1383_v31, %v1387_v32 }
 0x136   :  { %2677 = vmatprep.subr.bf16.mxu0 %v2916_v38  ;;  %v2582_v38 = vcombine.high %v1391_v35, %v1395_v36 }
 0x139   :  { %2678 = vmatpush3.bf16.msra.mxu0 %v2917_v39  ;;  %v1399_v39 = vld [vmem:[#allocation7 + $0x180] sm:$0xff] }
 0x13a   :  { %2679 = vmatprep.subr.bf16.mxu0 %v2918_v40  ;;  %v1403_v40 = vld [vmem:[#allocation7 + $0x1a0] sm:$0xff] }
 0x13d   :  { %2680 = vmatpush3.bf16.msra.mxu0 %v2919_v41  ;;  %v2581_v41 = vcombine.low %v1391_v35, %v1395_v36  ;;  %v1360_v35 = vld [vmem:[#allocation7 + $0x48] sm:$0xff] }
 0x13e   :  { %2681 = vmatprep.subr.bf16.mxu0 %v2920_v42  ;;  %v2590_v42 = vcombine.high %v1399_v39, %v1403_v40  ;;  %v1364_v36 = vld [vmem:[#allocation7 + $0x68] sm:$0xff] }
 0x141   :  { %2682 = vmatpush3.bf16.msra.mxu0 %v2921_v43  ;;  %v1407_v43 = vld [vmem:[#allocation7 + $0x1c0] sm:$0xff] }
 0x142   :  { %2683 = vmatprep.subr.bf16.mxu0 %v2922_v44  ;;  %v1411_v44 = vld [vmem:[#allocation7 + $0x1e0] sm:$0xff] }
 0x143   :  { %v2598_v46 = vcombine.high %v1407_v43, %v1411_v44  ;;  %v2597_v49 = vcombine.low %v1407_v43, %v1411_v44  ;;  %v1376_v44 = vld [vmem:[#allocation7 + $0xc8] sm:$0xff] }
 0x145   :  { %2684 = vmatpush3.bf16.msra.mxu0 %v2923_v45  ;;  %v2589_v45 = vcombine.low %v1399_v39, %v1403_v40  ;;  %v2552_v39 = vcombine.high %v1360_v35, %v1364_v36  ;;  %v1368_v40 = vld [vmem:[#allocation7 + $0x88] sm:$0xff] }
 0x1fb   :  { %v1055_v55 = vpop.f32.mrb[0].mxu0 }
 0x1fc   :  { %v2691_v56 = vadd.f32 %v1055_v55, %v251_v53  ;;  %v1057_v57 = vpop.f32.mrb[1].mxu0  ;;  %v1423_v53 = vld [vmem:[#allocation7 + $0x240] sm:$0xff]  ;;  %v2605_v55 = vcombine.low %v1415_v47, %v1419_v48  ;;  %v1384_v48 = vld [vmem:[#allocation7 + $0x108] sm:$0xff] }
 0x1fd   :  { %v2692_v58 = vadd.f32 %v1057_v57, %v255_v54  ;;  %v1059_v59 = vpop.f32.mrb[2].mxu0  ;;  %v1427_v54 = vld [vmem:[#allocation7 + $0x260] sm:$0xff] }
 0x1fe   :  { %v1062_v60 = vmax.f32 %v2691_v56, 0.0  ;;  %v1060_v61 = vpop.f32.mrb[3].mxu0  ;;  %v2614_v56 = vcombine.high %v1423_v53, %v1427_v54  ;;  %v1431_v57 = vld [vmem:[#allocation7 + $0x280] sm:$0xff]  ;;  %v2613_v59 = vcombine.low %v1423_v53, %v1427_v54  ;;  %v1392_v54 = vld [vmem:[#allocation7 + $0x148] sm:$0xff] }
 0x1ff   :  { %v1063_v62 = vmax.f32 %v2692_v58, 0.0  ;;  %v1435_v58 = vld [vmem:[#allocation7 + $0x2a0] sm:$0xff] }
 0x200   :  { %v1064_v0 = vpack.c.bf16 %v1062_v60, %v1062_v60  ;;  %v2622_v60 = vcombine.high %v1431_v57, %v1435_v58  ;;  %v1439_v61 = vld [vmem:[#allocation7 + $0x2c0] sm:$0xff] }
 0x201   :  { %v1065_v63 = vpack.c.bf16 %v1063_v62, %v1063_v62  ;;  %v1443_v62 = vld [vmem:[#allocation7 + $0x2e0] sm:$0xff] }
 0x202   :  { %v2629_v3 = vcombine.low %v1439_v61, %v1443_v62 }
 0x203   :  { %1233 = vmatprep.mubr.bf16.mxu0 %v1065_v63  ;;  %v2621_v63 = vcombine.low %v1431_v57, %v1435_v58  ;;  %v1400_v58 = vld [vmem:[#allocation7 + $0x188] sm:$0xff] }
 0x204   :  { %1234 = vmatmul.mubr.bf16.vlgmr.msra.gmra.mrb[4].mxu0 %v1064_v0  ;;  %v2630_v0 = vcombine.high %v1439_v61, %v1443_v62  ;;  %v1408_v62 = vld [vmem:[#allocation7 + $0x1c8] sm:$0xff] }
 0x2d7   :  { %v2685_v10 = vpop.f32.mrb[4].mxu0 }
 0x2d8   :  { %v2686_v12 = vpop.f32.mrb[5].mxu0 }
 0x2d9   :  { %v2687_v14 = vadd.f32 %v2686_v12, %v2685_v10  ;;  %v2688_v15 = vpop.f32.mrb[6].mxu0  ;;  %v1463_v10 = vld [vmem:[#allocation7 + $0x380] sm:$0xff] }
 0x2da   :  { %v2689_v17 = vpop.f32.mrb[7].mxu0  ;;  %v1471_v15 = vld [vmem:[#allocation7 + $0x3c0] sm:$0xff] }
 0x2db   :  { %v1236_v20 = vadd.f32 %v2687_v14, %v2515_v11  ;;  %v1467_v11 = vld [vmem:[#allocation7 + $0x3a0] sm:$0xff] }
 0x2dc   :  { %v2654_v12 = vcombine.high %v1463_v10, %v1467_v11  ;;  %v2653_v14 = vcombine.low %v1463_v10, %v1467_v11  ;;  %v1475_v17 = vld [vmem:[#allocation7 + $0x3e0] sm:$0xff]  ;;  %v1432_v10 = vld [vmem:[#allocation7 + $0x288] sm:$0xff] }
 0x2dd   :  { %v1241_v21 = vpack.c.bf16 %v1236_v20, %v1236_v20  ;;  %v2662_v18 = vcombine.high %v1471_v15, %v1475_v17  ;;  %v2661_v19 = vcombine.low %v1471_v15, %v1475_v17  ;;  %v1352_v20 = vld [vmem:[#allocation7 + $0x8] sm:$0xff] }
 0x2de   :  { %v1436_v11 = vld [vmem:[#allocation7 + $0x2a8] sm:$0xff] }
 0x2df   :  { %2540 = vmatmul.mubr.msk.bf16.vlgmr.msra.gmra.mrb[0].mxu1 %vm1302_vm0, %v1241_v21  ;;  %v1356_v21 = vld [vmem:[#allocation7 + $0x28] sm:$0xff] }
 0x2e0   :  { %2162 = vmatpush1.bf16.msra.mxu1 %v2541_v8  ;;  %v2646_v8 = vcombine.high %v1455_v5, %v1459_v6  ;;  %v2543_v23 = vcombine.low %v1352_v20, %v1356_v21  ;;  %v1424_v6 = vld [vmem:[#allocation7 + $0x248] sm:$0xff] }
 0x2e1   :  { %2163 = vmatprep.subr.bf16.mxu1 %v2550_v22  ;;  %v2544_v22 = vcombine.high %v1352_v20, %v1356_v21  ;;  %v1440_v15 = vld [vmem:[#allocation7 + $0x2c8] sm:$0xff] }
 0x2e2   :  { %v1444_v17 = vld [vmem:[#allocation7 + $0x2e8] sm:$0xff] }
 0x2e3   :  { %v1448_v20 = vld [vmem:[#allocation7 + $0x308] sm:$0xff] }
 0x2e4   :  { %2164 = vmatpush1.bf16.msra.mxu1 %v2549_v25  ;;  %v1255_v25 = vrot.slane %v1250_v24, %v3195_v50  ;;  %v1452_v21 = vld [vmem:[#allocation7 + $0x328] sm:$0xff] }
 0x2e5   :  { %2165 = vmatprep.subr.bf16.mxu1 %v2558_v26  ;;  %v1259_v26 = vrot.slane %v1250_v24, %v3201_v52  ;;  %v1456_v24 = vld [vmem:[#allocation7 + $0x348] sm:$0xff] }
 0x2e8   :  { %2166 = vmatpush1.bf16.msra.mxu1 %v2557_v29 }
 0x2e9   :  { %2167 = vmatprep.subr.bf16.mxu1 %v2566_v30 }
 0x2ec   :  { %2168 = vmatpush1.bf16.msra.mxu1 %v2565_v33 }
 0x2ed   :  { %2169 = vmatprep.subr.bf16.mxu1 %v2574_v34 }
 0x2f0   :  { %2170 = vmatpush1.bf16.msra.mxu1 %v2573_v37 }
 0x2f1   :  { %2171 = vmatprep.subr.bf16.mxu1 %v2582_v38 }
 0x2f4   :  { %2172 = vmatpush1.bf16.msra.mxu1 %v2581_v41  ;;  %v1372_v41 = vld [vmem:[#allocation7 + $0xa8] sm:$0xff] }
 0x2f5   :  { %2173 = vmatprep.subr.bf16.mxu1 %v2590_v42  ;;  %v2551_v42 = vcombine.low %v1360_v35, %v1364_v36  ;;  %v2560_v43 = vcombine.high %v1368_v40, %v1372_v41  ;;  %v1353_v36 = vld [vmem:[#allocation7 + $0x10] sm:$0xff] }
 0x2f8   :  { %2174 = vmatpush1.bf16.msra.mxu1 %v2589_v45  ;;  %v1380_v45 = vld [vmem:[#allocation7 + $0xe8] sm:$0xff] }
 0x2f9   :  { %2175 = vmatprep.subr.bf16.mxu1 %v2598_v46  ;;  %v2559_v46 = vcombine.low %v1368_v40, %v1372_v41  ;;  %v2568_v47 = vcombine.high %v1376_v44, %v1380_v45 }
 0x2fc   :  { %2176 = vmatpush1.bf16.msra.mxu1 %v2597_v49  ;;  %v1388_v49 = vld [vmem:[#allocation7 + $0x128] sm:$0xff] }
 0x2fd   :  { %2177 = vmatprep.subr.bf16.mxu1 %v2606_v51  ;;  %v2567_v51 = vcombine.low %v1376_v44, %v1380_v45  ;;  %v2576_v53 = vcombine.high %v1384_v48, %v1388_v49 }
 0x300   :  { %2178 = vmatpush1.bf16.msra.mxu1 %v2605_v55  ;;  %v1396_v55 = vld [vmem:[#allocation7 + $0x168] sm:$0xff] }
 0x301   :  { %2179 = vmatprep.subr.bf16.mxu1 %v2614_v56  ;;  %v2575_v56 = vcombine.low %v1384_v48, %v1388_v49  ;;  %v2584_v57 = vcombine.high %v1392_v54, %v1396_v55 }
 0x304   :  { %2180 = vmatpush1.bf16.msra.mxu1 %v2613_v59  ;;  %v1404_v59 = vld [vmem:[#allocation7 + $0x1a8] sm:$0xff] }
 0x305   :  { %2181 = vmatprep.subr.bf16.mxu1 %v2622_v60  ;;  %v2583_v60 = vcombine.low %v1392_v54, %v1396_v55  ;;  %v2592_v61 = vcombine.high %v1400_v58, %v1404_v59 }
 0x308   :  { %2182 = vmatpush1.bf16.msra.mxu1 %v2621_v63  ;;  %v1412_v63 = vld [vmem:[#allocation7 + $0x1e8] sm:$0xff] }
 0x309   :  { %2183 = vmatprep.subr.bf16.mxu1 %v2630_v0  ;;  %v2591_v0 = vcombine.low %v1400_v58, %v1404_v59  ;;  %v2600_v1 = vcombine.high %v1408_v62, %v1412_v63 }
 0x30c   :  { %2184 = vmatpush1.bf16.msra.mxu1 %v2629_v3  ;;  %v1420_v3 = vld [vmem:[#allocation7 + $0x228] sm:$0xff] }
 0x30d   :  { %2185 = vmatprep.subr.bf16.mxu1 %v2638_v4  ;;  %v2599_v4 = vcombine.low %v1408_v62, %v1412_v63  ;;  %v2608_v5 = vcombine.high %v1416_v2, %v1420_v3 }
 0x310   :  { %2186 = vmatpush1.bf16.msra.mxu1 %v2637_v7  ;;  %v1428_v7 = vld [vmem:[#allocation7 + $0x268] sm:$0xff] }
 0x311   :  { %2187 = vmatprep.subr.bf16.mxu1 %v2646_v8  ;;  %v2607_v8 = vcombine.low %v1416_v2, %v1420_v3 }
 0x314   :  { %2188 = vmatpush1.bf16.msra.mxu1 %v2645_v9  ;;  %v2616_v9 = vcombine.high %v1424_v6, %v1428_v7 }
 0x315   :  { %2189 = vmatprep.subr.bf16.mxu1 %v2654_v12  ;;  %v2615_v12 = vcombine.low %v1424_v6, %v1428_v7 }
 0x318   :  { %2190 = vmatpush1.bf16.msra.mxu1 %v2653_v14  ;;  %v2624_v14 = vcombine.high %v1432_v10, %v1436_v11 }
 0x319   :  { %2191 = vmatprep.subr.bf16.mxu1 %v2662_v18  ;;  %v2623_v18 = vcombine.low %v1432_v10, %v1436_v11 }
 0x31c   :  { %2192 = vmatpush1.bf16.msra.mxu1 %v2661_v19  ;;  %v2632_v19 = vcombine.high %v1440_v15, %v1444_v17 }
 0x31d   :  { %2202 = vmatprep.subr.bf16.mxu1 %v2544_v22  ;;  %v2631_v22 = vcombine.low %v1440_v15, %v1444_v17 }
 0x3b2   :  { %v1340_v27 = vpop.f32.mrb[0].mxu1 }
 0x3b3   :  { %v1341_v28 = vadd.f32 %v1340_v27, %v1255_v25  ;;  %v1342_v29 = vpop.f32.mrb[1].mxu1  ;;  %v1460_v25 = vld [vmem:[#allocation7 + $0x368] sm:$0xff] }
 0x3b4   :  { %v1343_v30 = vadd.f32 %v1342_v29, %v1259_v26  ;;  %v1344_v31 = vpop.f32.mrb[2].mxu1  ;;  %v2639_v26 = vcombine.low %v1448_v20, %v1452_v21  ;;  %v2648_v27 = vcombine.high %v1456_v24, %v1460_v25  ;;  %v1468_v29 = vld [vmem:[#allocation7 + $0x3a8] sm:$0xff] }
 0x3b5   :  { %v1347_v32 = vmax.f32 %v1341_v28, 0.0  ;;  %v1345_v33 = vpop.f32.mrb[3].mxu1  ;;  %v1464_v28 = vld [vmem:[#allocation7 + $0x388] sm:$0xff] }
 0x3b6   :  { %v1348_v34 = vmax.f32 %v1343_v30, 0.0  ;;  %v2647_v30 = vcombine.low %v1456_v24, %v1460_v25  ;;  %v2656_v31 = vcombine.high %v1464_v28, %v1468_v29  ;;  %v1476_v33 = vld [vmem:[#allocation7 + $0x3e8] sm:$0xff] }
 0x3b7   :  { %v3227_v38 = vpack.c.bf16 %v1347_v32, %v1347_v32  ;;  %v1472_v32 = vld [vmem:[#allocation7 + $0x3c8] sm:$0xff] }
 0x3b8   :  { %v3225_v37 = vpack.c.bf16 %v1348_v34, %v1348_v34  ;;  %v2655_v34 = vcombine.low %v1464_v28, %v1468_v29  ;;  %v2664_v35 = vcombine.high %v1472_v32, %v1476_v33  ;;  %v2663_v40 = vcombine.low %v1472_v32, %v1476_v33 }
 0x3ba   :  { %2193 = vmatprep.mubr.bf16.mxu1 %v3225_v37 }
 0x3bb   :  { %2194 = vmatmul.mubr.bf16.vlgmr.msra.gmra.mrb[4].mxu1 %v3227_v38 }
 0x3bc   :  { %2203 = vmatpush1.bf16.msra.mxu1 %v2543_v23  ;;  %2234 = vmatprep.mubr.bf16.mxu1 %v3225_v37  ;;  %v2640_v23 = vcombine.high %v1448_v20, %v1452_v21 }
 0x3bd   :  { %2204 = vmatprep.subr.bf16.mxu1 %v2552_v39  ;;  %v1357_v39 = vld [vmem:[#allocation7 + $0x30] sm:$0xff] }
 0x3be   :  { %v2546_v41 = vcombine.high %v1353_v36, %v1357_v39  ;;  %v2545_v44 = vcombine.low %v1353_v36, %v1357_v39 }
 0x3c0   :  { %2205 = vmatpush1.bf16.msra.mxu1 %v2551_v42  ;;  %v1361_v42 = vld [vmem:[#allocation7 + $0x50] sm:$0xff] }
 0x3c1   :  { %2206 = vmatprep.subr.bf16.mxu1 %v2560_v43  ;;  %v1365_v43 = vld [vmem:[#allocation7 + $0x70] sm:$0xff] }
 0x3c2   :  { %v2554_v45 = vcombine.high %v1361_v42, %v1365_v43  ;;  %v2553_v48 = vcombine.low %v1361_v42, %v1365_v43 }
 0x3c4   :  { %2207 = vmatpush1.bf16.msra.mxu1 %v2559_v46  ;;  %v1369_v46 = vld [vmem:[#allocation7 + $0x90] sm:$0xff] }
 0x3c5   :  { %2208 = vmatprep.subr.bf16.mxu1 %v2568_v47  ;;  %v1373_v47 = vld [vmem:[#allocation7 + $0xb0] sm:$0xff] }
 0x3c6   :  { %v2562_v49 = vcombine.high %v1369_v46, %v1373_v47  ;;  %v2561_v54 = vcombine.low %v1369_v46, %v1373_v47 }
 0x3c8   :  { %2209 = vmatpush1.bf16.msra.mxu1 %v2567_v51  ;;  %v1377_v51 = vld [vmem:[#allocation7 + $0xd0] sm:$0xff] }
 0x3c9   :  { %2210 = vmatprep.subr.bf16.mxu1 %v2576_v53  ;;  %v1381_v53 = vld [vmem:[#allocation7 + $0xf0] sm:$0xff] }
 0x3ca   :  { %v2570_v55 = vcombine.high %v1377_v51, %v1381_v53  ;;  %v2569_v58 = vcombine.low %v1377_v51, %v1381_v53 }
 0x3cc   :  { %2211 = vmatpush1.bf16.msra.mxu1 %v2575_v56  ;;  %v1385_v56 = vld [vmem:[#allocation7 + $0x110] sm:$0xff] }
 0x3cd   :  { %2212 = vmatprep.subr.bf16.mxu1 %v2584_v57  ;;  %v1389_v57 = vld [vmem:[#allocation7 + $0x130] sm:$0xff] }
 0x3ce   :  { %v2578_v59 = vcombine.high %v1385_v56, %v1389_v57  ;;  %v2577_v62 = vcombine.low %v1385_v56, %v1389_v57 }
 0x3d0   :  { %2213 = vmatpush1.bf16.msra.mxu1 %v2583_v60  ;;  %v1393_v60 = vld [vmem:[#allocation7 + $0x150] sm:$0xff] }
 0x3d1   :  { %2214 = vmatprep.subr.bf16.mxu1 %v2592_v61  ;;  %v1397_v61 = vld [vmem:[#allocation7 + $0x170] sm:$0xff] }
 0x3d2   :  { %v2586_v63 = vcombine.high %v1393_v60, %v1397_v61  ;;  %v2585_v2 = vcombine.low %v1393_v60, %v1397_v61 }
 0x3d4   :  { %2215 = vmatpush1.bf16.msra.mxu1 %v2591_v0  ;;  %v1401_v0 = vld [vmem:[#allocation7 + $0x190] sm:$0xff] }
 0x3d5   :  { %2216 = vmatprep.subr.bf16.mxu1 %v2600_v1  ;;  %v1405_v1 = vld [vmem:[#allocation7 + $0x1b0] sm:$0xff] }
 0x3d6   :  { %v2594_v3 = vcombine.high %v1401_v0, %v1405_v1  ;;  %v2593_v6 = vcombine.low %v1401_v0, %v1405_v1 }
 0x3d8   :  { %2217 = vmatpush1.bf16.msra.mxu1 %v2599_v4  ;;  %v1409_v4 = vld [vmem:[#allocation7 + $0x1d0] sm:$0xff] }
 0x3d9   :  { %2218 = vmatprep.subr.bf16.mxu1 %v2608_v5  ;;  %v1413_v5 = vld [vmem:[#allocation7 + $0x1f0] sm:$0xff] }
 0x3da   :  { %v2602_v7 = vcombine.high %v1409_v4, %v1413_v5  ;;  %v2601_v10 = vcombine.low %v1409_v4, %v1413_v5  ;;  %v1402_v5 = vld [vmem:[#allocation7 + $0x198] sm:$0xff] }
 0x3dc   :  { %2219 = vmatpush1.bf16.msra.mxu1 %v2607_v8  ;;  %v1417_v8 = vld [vmem:[#allocation7 + $0x210] sm:$0xff] }
 0x3dd   :  { %2220 = vmatprep.subr.bf16.mxu1 %v2616_v9  ;;  %v1421_v9 = vld [vmem:[#allocation7 + $0x230] sm:$0xff] }
 0x3de   :  { %v2610_v11 = vcombine.high %v1417_v8, %v1421_v9  ;;  %v2609_v15 = vcombine.low %v1417_v8, %v1421_v9  ;;  %v1410_v9 = vld [vmem:[#allocation7 + $0x1d8] sm:$0xff] }
 0x3e0   :  { %2221 = vmatpush1.bf16.msra.mxu1 %v2615_v12  ;;  %v1425_v12 = vld [vmem:[#allocation7 + $0x250] sm:$0xff] }
 0x3e1   :  { %2222 = vmatprep.subr.bf16.mxu1 %v2624_v14  ;;  %v1429_v14 = vld [vmem:[#allocation7 + $0x270] sm:$0xff] }
 0x3e2   :  { %v2618_v17 = vcombine.high %v1425_v12, %v1429_v14  ;;  %v2617_v20 = vcombine.low %v1425_v12, %v1429_v14  ;;  %v1418_v14 = vld [vmem:[#allocation7 + $0x218] sm:$0xff] }
 0x3e4   :  { %2223 = vmatpush1.bf16.msra.mxu1 %v2623_v18  ;;  %v1433_v18 = vld [vmem:[#allocation7 + $0x290] sm:$0xff] }
 0x3e5   :  { %2224 = vmatprep.subr.bf16.mxu1 %v2632_v19  ;;  %v1437_v19 = vld [vmem:[#allocation7 + $0x2b0] sm:$0xff] }
 0x3e6   :  { %v2626_v21 = vcombine.high %v1433_v18, %v1437_v19  ;;  %v2625_v24 = vcombine.low %v1433_v18, %v1437_v19  ;;  %v1426_v19 = vld [vmem:[#allocation7 + $0x258] sm:$0xff] }
 0x3e8   :  { %2225 = vmatpush1.bf16.msra.mxu1 %v2631_v22  ;;  %v1441_v22 = vld [vmem:[#allocation7 + $0x2d0] sm:$0xff] }
 0x3e9   :  { %2226 = vmatprep.subr.bf16.mxu1 %v2640_v23  ;;  %v1445_v23 = vld [vmem:[#allocation7 + $0x2f0] sm:$0xff] }
 0x3ea   :  { %v2634_v25 = vcombine.high %v1441_v22, %v1445_v23  ;;  %v2633_v28 = vcombine.low %v1441_v22, %v1445_v23  ;;  %v1434_v23 = vld [vmem:[#allocation7 + $0x298] sm:$0xff] }
 0x3ec   :  { %2227 = vmatpush1.bf16.msra.mxu1 %v2639_v26  ;;  %v1449_v26 = vld [vmem:[#allocation7 + $0x310] sm:$0xff] }
 0x3ed   :  { %2228 = vmatprep.subr.bf16.mxu1 %v2648_v27  ;;  %v1453_v27 = vld [vmem:[#allocation7 + $0x330] sm:$0xff] }
 0x3ee   :  { %v2642_v29 = vcombine.high %v1449_v26, %v1453_v27  ;;  %v2641_v32 = vcombine.low %v1449_v26, %v1453_v27  ;;  %v1442_v27 = vld [vmem:[#allocation7 + $0x2d8] sm:$0xff] }
 0x3f0   :  { %2229 = vmatpush1.bf16.msra.mxu1 %v2647_v30  ;;  %v1457_v30 = vld [vmem:[#allocation7 + $0x350] sm:$0xff] }
 0x3f1   :  { %2230 = vmatprep.subr.bf16.mxu1 %v2656_v31  ;;  %v1461_v31 = vld [vmem:[#allocation7 + $0x370] sm:$0xff] }
 0x3f2   :  { %v2650_v33 = vcombine.high %v1457_v30, %v1461_v31  ;;  %v2649_v36 = vcombine.low %v1457_v30, %v1461_v31  ;;  %v1450_v31 = vld [vmem:[#allocation7 + $0x318] sm:$0xff] }
 0x3f4   :  { %2231 = vmatpush1.bf16.msra.mxu1 %v2655_v34  ;;  %v1465_v34 = vld [vmem:[#allocation7 + $0x390] sm:$0xff] }
 0x3f5   :  { %2232 = vmatprep.subr.bf16.mxu1 %v2664_v35  ;;  %v1469_v35 = vld [vmem:[#allocation7 + $0x3b0] sm:$0xff] }
 0x3f6   :  { %v2658_v39 = vcombine.high %v1465_v34, %v1469_v35  ;;  %v2657_v42 = vcombine.low %v1465_v34, %v1469_v35  ;;  %v1458_v35 = vld [vmem:[#allocation7 + $0x358] sm:$0xff] }
 0x3f8   :  { %2233 = vmatpush1.bf16.msra.mxu1 %v2663_v40  ;;  %v1473_v40 = vld [vmem:[#allocation7 + $0x3d0] sm:$0xff] }
 0x3f9   :  { %2243 = vmatprep.subr.bf16.mxu1 %v2546_v41  ;;  %v1477_v41 = vld [vmem:[#allocation7 + $0x3f0] sm:$0xff] }
 0x3fa   :  { %v2666_v43 = vcombine.high %v1473_v40, %v1477_v41  ;;  %v2665_v46 = vcombine.low %v1473_v40, %v1477_v41  ;;  %v1466_v41 = vld [vmem:[#allocation7 + $0x398] sm:$0xff] }
 0x3fb   :  { %2235 = vmatmul.mubr.bf16.vlgmr.msra.gmra.mrb[8].mxu1 %v3227_v38 }
 0x3fc   :  { %2244 = vmatpush1.bf16.msra.mxu1 %v2545_v44  ;;  %2275 = vmatprep.mubr.bf16.mxu1 %v3225_v37  ;;  %v1354_v44 = vld [vmem:[#allocation7 + $0x18] sm:$0xff] }
 0x3fd   :  { %2245 = vmatprep.subr.bf16.mxu1 %v2554_v45  ;;  %v1358_v45 = vld [vmem:[#allocation7 + $0x38] sm:$0xff] }
 0x3fe   :  { %v2548_v47 = vcombine.high %v1354_v44, %v1358_v45  ;;  %v2547_v51 = vcombine.low %v1354_v44, %v1358_v45  ;;  %v1474_v45 = vld [vmem:[#allocation7 + $0x3d8] sm:$0xff] }
 0x400   :  { %2246 = vmatpush1.bf16.msra.mxu1 %v2553_v48  ;;  %v1362_v48 = vld [vmem:[#allocation7 + $0x58] sm:$0xff] }
 0x401   :  { %2247 = vmatprep.subr.bf16.mxu1 %v2562_v49  ;;  %v1366_v49 = vld [vmem:[#allocation7 + $0x78] sm:$0xff] }
 0x402   :  { %v2556_v53 = vcombine.high %v1362_v48, %v1366_v49  ;;  %v2555_v56 = vcombine.low %v1362_v48, %v1366_v49 }
 0x404   :  { %2248 = vmatpush1.bf16.msra.mxu1 %v2561_v54  ;;  %v1370_v54 = vld [vmem:[#allocation7 + $0x98] sm:$0xff] }
 0x405   :  { %2249 = vmatprep.subr.bf16.mxu1 %v2570_v55  ;;  %v1374_v55 = vld [vmem:[#allocation7 + $0xb8] sm:$0xff] }
 0x406   :  { %v2564_v57 = vcombine.high %v1370_v54, %v1374_v55  ;;  %v2563_v60 = vcombine.low %v1370_v54, %v1374_v55 }
 0x408   :  { %2250 = vmatpush1.bf16.msra.mxu1 %v2569_v58  ;;  %v1378_v58 = vld [vmem:[#allocation7 + $0xd8] sm:$0xff] }
 0x409   :  { %2251 = vmatprep.subr.bf16.mxu1 %v2578_v59  ;;  %v1382_v59 = vld [vmem:[#allocation7 + $0xf8] sm:$0xff] }
 0x40a   :  { %v2572_v61 = vcombine.high %v1378_v58, %v1382_v59  ;;  %v2571_v0 = vcombine.low %v1378_v58, %v1382_v59 }
 0x40c   :  { %2252 = vmatpush1.bf16.msra.mxu1 %v2577_v62  ;;  %v1386_v62 = vld [vmem:[#allocation7 + $0x118] sm:$0xff] }
 0x40d   :  { %2253 = vmatprep.subr.bf16.mxu1 %v2586_v63  ;;  %v1390_v63 = vld [vmem:[#allocation7 + $0x138] sm:$0xff] }
 0x40e   :  { %v2580_v1 = vcombine.high %v1386_v62, %v1390_v63  ;;  %v2579_v4 = vcombine.low %v1386_v62, %v1390_v63  ;;  %v1491_v62 = vsub.s32 2, %v3096_v13  ;;  %v1495_v63 = vsub.s32 3, %v3096_v13 }
 0x410   :  { %2254 = vmatpush1.bf16.msra.mxu1 %v2585_v2  ;;  %v1394_v2 = vld [vmem:[#allocation7 + $0x158] sm:$0xff] }
 0x411   :  { %2255 = vmatprep.subr.bf16.mxu1 %v2594_v3  ;;  %v1398_v3 = vld [vmem:[#allocation7 + $0x178] sm:$0xff] }
 0x414   :  { %2256 = vmatpush1.bf16.msra.mxu1 %v2593_v6  ;;  %v1406_v6 = vld [vmem:[#allocation7 + $0x1b8] sm:$0xff] }
 0x415   :  { %2257 = vmatprep.subr.bf16.mxu1 %v2602_v7  ;;  %v2587_v7 = vcombine.low %v1394_v2, %v1398_v3  ;;  %v2596_v8 = vcombine.high %v1402_v5, %v1406_v6 }
 0x418   :  { %2258 = vmatpush1.bf16.msra.mxu1 %v2601_v10  ;;  %v1414_v10 = vld [vmem:[#allocation7 + $0x1f8] sm:$0xff] }
 0x419   :  { %2259 = vmatprep.subr.bf16.mxu1 %v2610_v11  ;;  %v2595_v11 = vcombine.low %v1402_v5, %v1406_v6  ;;  %v2604_v12 = vcombine.high %v1410_v9, %v1414_v10 }
 0x41c   :  { %2260 = vmatpush1.bf16.msra.mxu1 %v2609_v15  ;;  %v1422_v15 = vld [vmem:[#allocation7 + $0x238] sm:$0xff] }
 0x41d   :  { %2261 = vmatprep.subr.bf16.mxu1 %v2618_v17  ;;  %v2603_v17 = vcombine.low %v1410_v9, %v1414_v10  ;;  %v2612_v18 = vcombine.high %v1418_v14, %v1422_v15  ;;  %v1503_v9 = vsub.s32 5, %v3096_v13 }
 0x420   :  { %2262 = vmatpush1.bf16.msra.mxu1 %v2617_v20  ;;  %v1430_v20 = vld [vmem:[#allocation7 + $0x278] sm:$0xff] }
 0x421   :  { %2263 = vmatprep.subr.bf16.mxu1 %v2626_v21  ;;  %v2611_v21 = vcombine.low %v1418_v14, %v1422_v15  ;;  %v2620_v22 = vcombine.high %v1426_v19, %v1430_v20 }
 0x424   :  { %2264 = vmatpush1.bf16.msra.mxu1 %v2625_v24  ;;  %v1438_v24 = vld [vmem:[#allocation7 + $0x2b8] sm:$0xff] }
 0x425   :  { %2265 = vmatprep.subr.bf16.mxu1 %v2634_v25  ;;  %v2619_v25 = vcombine.low %v1426_v19, %v1430_v20  ;;  %v2628_v26 = vcombine.high %v1434_v23, %v1438_v24 }
 0x428   :  { %2266 = vmatpush1.bf16.msra.mxu1 %v2633_v28  ;;  %v1446_v28 = vld [vmem:[#allocation7 + $0x2f8] sm:$0xff] }
 0x429   :  { %2267 = vmatprep.subr.bf16.mxu1 %v2642_v29  ;;  %v2627_v29 = vcombine.low %v1434_v23, %v1438_v24  ;;  %v2636_v30 = vcombine.high %v1442_v27, %v1446_v28 }
 0x42c   :  { %2268 = vmatpush1.bf16.msra.mxu1 %v2641_v32  ;;  %v1454_v32 = vld [vmem:[#allocation7 + $0x338] sm:$0xff] }
 0x42d   :  { %2269 = vmatprep.subr.bf16.mxu1 %v2650_v33  ;;  %v2635_v33 = vcombine.low %v1442_v27, %v1446_v28  ;;  %v2644_v34 = vcombine.high %v1450_v31, %v1454_v32 }
 0x430   :  { %2270 = vmatpush1.bf16.msra.mxu1 %v2649_v36  ;;  %v1462_v36 = vld [vmem:[#allocation7 + $0x378] sm:$0xff] }
 0x431   :  { %2271 = vmatprep.subr.bf16.mxu1 %v2658_v39  ;;  %v2643_v39 = vcombine.low %v1450_v31, %v1454_v32  ;;  %v2652_v40 = vcombine.high %v1458_v35, %v1462_v36 }
 0x434   :  { %2272 = vmatpush1.bf16.msra.mxu1 %v2657_v42  ;;  %v1470_v42 = vld [vmem:[#allocation7 + $0x3b8] sm:$0xff] }
 0x435   :  { %2273 = vmatprep.subr.bf16.mxu1 %v2666_v43  ;;  %v2651_v43 = vcombine.low %v1458_v35, %v1462_v36  ;;  %v2660_v44 = vcombine.high %v1466_v41, %v1470_v42 }
 0x438   :  { %2274 = vmatpush1.bf16.msra.mxu1 %v2665_v46  ;;  %v1478_v46 = vld [vmem:[#allocation7 + $0x3f8] sm:$0xff] }
 0x439   :  { %2284 = vmatprep.subr.bf16.mxu1 %v2548_v47  ;;  %v2659_v47 = vcombine.low %v1466_v41, %v1470_v42  ;;  %v2668_v48 = vcombine.high %v1474_v45, %v1478_v46  ;;  %v2667_v49 = vcombine.low %v1474_v45, %v1478_v46 }
 0x43b   :  { %2276 = vmatmul.mubr.bf16.vlgmr.msra.gmra.mrb[12].mxu1 %v3227_v38 }
 0x43c   :  { %2285 = vmatpush1.bf16.msra.mxu1 %v2547_v51  ;;  %2316 = vmatprep.mubr.bf16.mxu1 %v3225_v37  ;;  %v2588_v37 = vcombine.high %v1394_v2, %v1398_v3  ;;  %v1479_v51 = vld [vmem:[%s3273_s9] sm:$0xff]  ;;  %s3016_s9 = smov [#allocation9]  }
 0x43d   :  { %2286 = vmatprep.subr.bf16.mxu1 %v2556_v53  ;;  %v1484_v53 = vrot.slane %v1479_v51, %v3195_v50  ;;  %v1488_v54 = vrot.slane %v1479_v51, %v3201_v52  ;;  %s2377_s23 = sshll.u32 %s3016_s9, 4  ;;  %s2378_s23 = int_to_ptr.vmem [resolvable:$true] %s2377_s23 }
 0x43e   :  { %s2980_s24 = scalar_lea.vmem %s2378_s23, 256  ;;  %p2985_p3 = scmp.lt.s32.totalorder %s2378_s23, %s2378_s23 }
 0x43f   :  { %p2981_p2 = scmp.ne.s32.totalorder %s2378_s23, %s2980_s24  ;;  %p2986_p4 = scmp.lt.s32.totalorder %s2980_s24, %s2980_s24 }
 0x440   :  { %2287 = vmatpush1.bf16.msra.mxu1 %v2555_v56 }
 0x441   :  { %2288 = vmatprep.subr.bf16.mxu1 %v2564_v57  ;;  %p2987_p5 = por %p2986_p4, %p2985_p3 }
 0x443   :  { %p2988_p6 = pnand %p2987_p5, %p2981_p2 }
 0x444   :  { %2289 = vmatpush1.bf16.msra.mxu1 %v2563_v60 }
 0x445   :  { %2290 = vmatprep.subr.bf16.mxu1 %v2572_v61 }
 0x448   :  { %2291 = vmatpush1.bf16.msra.mxu1 %v2571_v0  ;;  %v1496_v0 = vrot.slane %v1479_v51, %v1495_v63 }
 0x449   :  { %2292 = vmatprep.subr.bf16.mxu1 %v2580_v1 }
 0x44c   :  { %2293 = vmatpush1.bf16.msra.mxu1 %v2579_v4 }
 0x44d   :  { %2294 = vmatprep.subr.bf16.mxu1 %v2588_v37 }
 0x450   :  { %2295 = vmatpush1.bf16.msra.mxu1 %v2587_v7 }
 0x451   :  { %2296 = vmatprep.subr.bf16.mxu1 %v2596_v8  ;;  %v1499_v8 = vsub.s32 4, %v3096_v13 }
 0x453   :  { %v1500_v10 = vrot.slane %v1479_v51, %v1499_v8 }
 0x454   :  { %2297 = vmatpush1.bf16.msra.mxu1 %v2595_v11  ;;  %v1504_v11 = vrot.slane %v1479_v51, %v1503_v9 }
 0x455   :  { %2298 = vmatprep.subr.bf16.mxu1 %v2604_v12 }
 0x458   :  { %2299 = vmatpush1.bf16.msra.mxu1 %v2603_v17 }
 0x459   :  { %2300 = vmatprep.subr.bf16.mxu1 %v2612_v18 }
 0x45c   :  { %2301 = vmatpush1.bf16.msra.mxu1 %v2611_v21  ;;  %v1507_v21 = vsub.s32 6, %v3096_v13 }
 0x45d   :  { %2302 = vmatprep.subr.bf16.mxu1 %v2620_v22  ;;  %v1511_v22 = vsub.s32 7, %v3096_v13 }
 0x45e   :  { %v1508_v23 = vrot.slane %v1479_v51, %v1507_v21 }
 0x45f   :  { %v1512_v24 = vrot.slane %v1479_v51, %v1511_v22 }
 0x460   :  { %2303 = vmatpush1.bf16.msra.mxu1 %v2619_v25 }
 0x461   :  { %2304 = vmatprep.subr.bf16.mxu1 %v2628_v26 }
 0x464   :  { %2305 = vmatpush1.bf16.msra.mxu1 %v2627_v29 }
 0x465   :  { %2306 = vmatprep.subr.bf16.mxu1 %v2636_v30 }
 0x468   :  { %2307 = vmatpush1.bf16.msra.mxu1 %v2635_v33 }
 0x469   :  { %2308 = vmatprep.subr.bf16.mxu1 %v2644_v34 }
 0x46c   :  { %2309 = vmatpush1.bf16.msra.mxu1 %v2643_v39 }
 0x46d   :  { %2310 = vmatprep.subr.bf16.mxu1 %v2652_v40 }
 0x470   :  { %2311 = vmatpush1.bf16.msra.mxu1 %v2651_v43 }
 0x471   :  { %2312 = vmatprep.subr.bf16.mxu1 %v2660_v44 }
 0x474   :  { %2313 = vmatpush1.bf16.msra.mxu1 %v2659_v47 }
 0x475   :  { %2314 = vmatprep.subr.bf16.mxu1 %v2668_v48 }
 0x478   :  { %2315 = vmatpush1.bf16.msra.mxu1 %v2667_v49 }
 0x47b   :  { %2317 = vmatmul.mubr.bf16.vlgmr.msra.gmra.mrb[16].mxu1 %v3227_v38  ;;  %v1492_v38 = vrot.slane %v1479_v51, %v1491_v62 }
 0x48e   :  { %v2195_v55 = vpop.f32.mrb[4].mxu1 }
 0x48f   :  { %v2196_v56 = vadd.f32 %v2195_v55, %v1484_v53  ;;  %v2197_v57 = vpop.f32.mrb[5].mxu1 }
 0x490   :  { %v2198_v58 = vadd.f32 %v2197_v57, %v1488_v54  ;;  %v2199_v59 = vpop.f32.mrb[6].mxu1 }
 0x491   :  { %v2200_v60 = vpop.f32.mrb[7].mxu1 }
 0x492   :  { %v2333_v61 = vcombine.low %v2196_v56, %v2198_v58 }
 0x494   :  { %v2341_v5 = vrot.slane %v2333_v61, %v3099_v16 }
 0x4ce   :  { %v2236_v1 = vpop.f32.mrb[8].mxu1 }
 0x4cf   :  { %v2237_v2 = vadd.f32 %v2236_v1, %v1492_v38  ;;  %v2238_v3 = vpop.f32.mrb[9].mxu1 }
 0x4d0   :  { %v2239_v4 = vadd.f32 %v2238_v3, %v1496_v0  ;;  %v2240_v50 = vpop.f32.mrb[10].mxu1 }
 0x4d1   :  { %v2241_v37 = vpop.f32.mrb[11].mxu1 }
 0x4d2   :  { %v2334_v52 = vcombine.low %v2237_v2, %v2239_v4 }
 0x4d4   :  { %v2348_v6 = vrot.slane %v2334_v52, %v3099_v16 }
 0x4d6   :  { %v2349_v7 = vcombine.low %v2341_v5, %v2348_v6 }
 0x4d8   :  { %2369 = vst [vmem:[#allocation9] sm:$0xff] %v2349_v7 }
 0x50e   :  { %v2277_v12 = vpop.f32.mrb[12].mxu1 }
 0x50f   :  { %v2278_v14 = vadd.f32 %v2277_v12, %v1500_v10  ;;  %v2279_v15 = vpop.f32.mrb[13].mxu1 }
 0x510   :  { %v2280_v17 = vadd.f32 %v2279_v15, %v1504_v11  ;;  %v2281_v18 = vpop.f32.mrb[14].mxu1 }
 0x511   :  { %v2282_v19 = vpop.f32.mrb[15].mxu1 }
 0x512   :  { %v2350_v20 = vcombine.low %v2278_v14, %v2280_v17 }
 0x514   :  { %v2358_v32 = vrot.slane %v2350_v20, %v3099_v16 }
 0x54e   :  { %v2318_v25 = vpop.f32.mrb[16].mxu1 }
 0x54f   :  { %v2319_v26 = vadd.f32 %v2318_v25, %v1508_v23  ;;  %v2320_v27 = vpop.f32.mrb[17].mxu1 }
 0x550   :  { %v2321_v28 = vadd.f32 %v2320_v27, %v1512_v24  ;;  %v2322_v29 = vpop.f32.mrb[18].mxu1 }
 0x551   :  { %v2323_v30 = vpop.f32.mrb[19].mxu1 }
 0x552   :  { %v2351_v31 = vcombine.low %v2319_v26, %v2321_v28 }
 0x554   :  { %v2365_v33 = vrot.slane %v2351_v31, %v3099_v16 }
 0x556   :  { %v2366_v34 = vcombine.low %v2358_v32, %v2365_v33 }
 0x558   :  { %2370 = vst [vmem:[#allocation9 + $0x8] sm:$0xff] %v2366_v34 }
 0x559   :  { %2991 = shalt.err (!%p2988_p6)
}
 0x55a   :  { %s2992_s26 = scalar_lea.hbm %s3274_s10, 256 }
 0x55b   :  { %p2993_p7 = scmp.ne.s32.totalorder %s3274_s10, %s2992_s26  ;;  %p2996_p8 = scmp.lt.u32.totalorder %s2992_s26, %s3274_s10 }
 0x55d   :  { %p2998_p9 = pnand %p2996_p8, %p2993_p7 }
 0x55f   :  { %3001 = shalt.err (!%p2998_p9)
}
 0x560   :  { %2380 = dma.vmem_to_hbm [thread:$0]  %s2378_s23, 256, %s3274_s10, [#allocation6]  }
 0x561   :  { %3006 = dma.done.wait [#allocation6], 256  }
 0x562   :  { %3007 = vsyncadd [#allocation6], 4294967040 }
 0x563   :  { %2384 = vsyncpa [#allocation5], 1 }
 0x564   :  { %2385 = vsyncpa [#allocation8], 1 }
 0x565   :  { %2386 = vsyncpa [#allocation6], 1 }

</bundles_post_ra>
